<compile_context>
chip_gen: v5e
topology: v5e:2x2
jax: 0.10.0
libtpu: 0.0.40
codegen_flags: <defaults>
</compile_context>

<pallas_src>
import jax
import jax.numpy as jnp
from jax.experimental import pallas as pl
from jax.experimental.pallas import tpu as pltpu

H1, H2, H3 = 32, 16, 1   # hidden sizes of the num_layers=2 variant
BN_EPS = 1e-5
LANE = 128
ROWS = 16                # output sublane rows per grid tile == in-kernel chunks/tile


def _mlp_kernel(x_ref, w1_ref, c1_ref, w2_ref, c2_ref, w3_ref, c3_ref, o_ref):
    # x_ref: (D, ROWS*chunk) f32 -- batch on the lane axis.
    # o_ref: (ROWS, chunk) f32   -- dense output slab for this tile.
    rows, chunk = o_ref.shape

    w1 = w1_ref[...]   # (H1, D)  folded Linear+BN(eval) weight
    c1 = c1_ref[...]   # (H1, 1)  folded bias
    w2 = w2_ref[...]   # (H2, H1)
    c2 = c2_ref[...]   # (H2, 1)
    w3 = w3_ref[...]   # (H2, 1)  output head column
    c3 = c3_ref[...]   # (1, 1)   output bias

    # Iterate over lane sub-chunks of the big x tile so the f32 intermediates
    # ((H1,chunk), (H2,chunk)) stay ~1-2 MiB regardless of the DMA tile size.
    # Chunk j's (1, chunk) result becomes row j of the output block, so the
    # HBM writeback is a dense (ROWS, chunk) slab (no strided 1-sublane DMA).
    for j in range(rows):                                   # static trip count
        xj = x_ref[:, j * chunk:(j + 1) * chunk]                       # (D, chunk)

        # Layer 1: fused Linear+BN(eval) -> ReLU  (Dropout = identity in eval)
        h = jnp.dot(w1, xj, preferred_element_type=jnp.float32)        # (H1, chunk) MXU
        h = jnp.maximum(h + c1, 0.0)

        # Layer 2: fused Linear+BN(eval) -> ReLU  (Dropout = identity in eval)
        h = jnp.dot(w2, h, preferred_element_type=jnp.float32)         # (H2, chunk) MXU
        h = jnp.maximum(h + c2, 0.0)

        # Output Linear(16,1): per-feature scale + sublane reduce (VPU/XLU;
        # a 1-row MXU matmul would waste the array).
        out = jnp.sum(h * w3, axis=0, keepdims=True) + c3              # (1, chunk)
        o_ref[j:j + 1, :] = out.astype(o_ref.dtype)


def bike_volume_nn_forward(x, params, *, chunk_max=8192):
    """Eval-mode forward. x: (N, D) float32; params: dict of arrays. Returns (N, 1)."""
    n, d = x.shape

    # ---- fold eval-mode BatchNorm + bias into the weights (wrapper glue) ----
    def fold_layer(w, b, gamma, beta, mean, var):
        s = gamma / jnp.sqrt(var + BN_EPS)            # per-output-feature scale
        w_f = (w * s).T                               # (out, in), feature-major
        c = (b * s + beta - mean * s).reshape(-1, 1)  # (out, 1)
        return w_f.astype(jnp.float32), c.astype(jnp.float32)

    w1f, c1 = fold_layer(params["w1"], params["b1"], params["bn1_gamma"],
                         params["bn1_beta"], params["bn1_mean"], params["bn1_var"])
    w2f, c2 = fold_layer(params["w2"], params["b2"], params["bn2_gamma"],
                         params["bn2_beta"], params["bn2_mean"], params["bn2_var"])
    w3c = params["w3"].reshape(H2, H3).astype(jnp.float32)   # (16, 1)
    c3 = params["b3"].reshape(1, 1).astype(jnp.float32)      # (1, 1) (robust to H3 changes)

    # ---- tile sizing: big DMA tiles, aligned, grid >= 2 when there's enough work ----
    align = ROWS * LANE                    # tile_n granularity (2048 lanes)
    tile_max = ROWS * chunk_max            # default 131072 lanes per grid step
    num_tiles = max(1, pl.cdiv(n, tile_max))
    if n > align:
        num_tiles = max(num_tiles, 2)      # keep both v7x TensorCores busy
    tile_n = pl.cdiv(pl.cdiv(n, num_tiles), align) * align
    chunk = tile_n // ROWS                 # in-kernel lane sub-chunk (multiple of 128)
    n_pad = num_tiles * tile_n

    # Feature-major layout: batch on the 128-wide lane axis. Kept f32: at D=8 a bf16
    # cast saves zero HBM bytes (sublane padding) and only costs accuracy.
    # Padded batch columns compute relu(c) garbage that is sliced off below (intentional).
    # TODO(synk): accept x feature-major (D, N) upstream to skip this extra pad+transpose
    # HBM pass over x.
    x_t = jnp.pad(x, ((0, n_pad - n), (0, 0))).T              # (d, n_pad) f32

    rep = lambda i: (0, 0)
    out = pl.pallas_call(
        _mlp_kernel,
        out_shape=jax.ShapeDtypeStruct((num_tiles * ROWS, chunk), jnp.float32),
        grid=(num_tiles,),
        in_specs=[
            pl.BlockSpec((d, tile_n), lambda i: (0, i)),    # x tile (lane-dense, f32)
            pl.BlockSpec((H1, d), rep),                     # folded W1 (resident)
            pl.BlockSpec((H1, 1), rep),                     # folded bias/BN 1
            pl.BlockSpec((H2, H1), rep),                    # folded W2
            pl.BlockSpec((H2, 1), rep),                     # folded bias/BN 2
            pl.BlockSpec((H2, H3), rep),                    # W3 column
            pl.BlockSpec((1, 1), rep),                      # b3
        ],
        out_specs=pl.BlockSpec((ROWS, chunk), lambda i: (i, 0)),
        compiler_params=pltpu.CompilerParams(
            dimension_semantics=("parallel",),
            vmem_limit_bytes=32 * 1024 * 1024),
    )(x_t, w1f, c1, w2f, c2, w3c, c3)

    # Row-major flatten of (num_tiles*ROWS, chunk) restores the sample order:
    # flat = (tile*ROWS + row)*chunk + col = tile*tile_n + row*chunk + col.
    return out.reshape(-1)[:n].reshape(n, 1)


def init_params(key, input_dim):
    """Deterministic synthetic parameters matching BikeVolumeNN(num_layers=2)."""
    ks = jax.random.split(key, 8)
    u = lambda k, shape, bound: jax.random.uniform(
        k, shape, jnp.float32, minval=-bound, maxval=bound)
    b_in = 1.0 / jnp.sqrt(jnp.float32(input_dim))
    b_h1 = 1.0 / jnp.sqrt(jnp.float32(H1))
    b_h2 = 1.0 / jnp.sqrt(jnp.float32(H2))
    return {
        "w1": u(ks[0], (input_dim, H1), b_in),
        "b1": u(ks[1], (H1,), b_in),
        "w2": u(ks[2], (H1, H2), b_h1),
        "b2": u(ks[3], (H2,), b_h1),
        "w3": u(ks[4], (H2, H3), b_h2),
        "b3": u(ks[5], (H3,), b_h2),
        # BatchNorm1d affine + running stats (eval mode), nontrivial values.
        "bn1_gamma": 1.0 + 0.1 * jax.random.normal(ks[6], (H1,), jnp.float32),
        "bn1_beta": 0.05 * jnp.arange(H1, dtype=jnp.float32),
        "bn1_mean": 0.01 * jnp.arange(H1, dtype=jnp.float32),
        "bn1_var": 1.0 + 0.02 * jnp.arange(H1, dtype=jnp.float32),
        "bn2_gamma": 1.0 + 0.1 * jax.random.normal(ks[7], (H2,), jnp.float32),
        "bn2_beta": -0.05 * jnp.arange(H2, dtype=jnp.float32),
        "bn2_mean": 0.02 * jnp.arange(H2, dtype=jnp.float32),
        "bn2_var": 1.0 + 0.03 * jnp.arange(H2, dtype=jnp.float32),
    }


def reference_forward(x, params):
    """Pure-JAX f32 reference of the same eval-mode forward for verification."""
    def fold_bn(g, b, m, v):
        s = g / jnp.sqrt(v + BN_EPS)
        return s, b - m * s
    s1, t1 = fold_bn(params["bn1_gamma"], params["bn1_beta"],
                     params["bn1_mean"], params["bn1_var"])
    s2, t2 = fold_bn(params["bn2_gamma"], params["bn2_beta"],
                     params["bn2_mean"], params["bn2_var"])
    h = jnp.maximum((x @ params["w1"] + params["b1"]) * s1 + t1, 0.0)
    h = jnp.maximum((h @ params["w2"] + params["b2"]) * s2 + t2, 0.0)
    return h @ params["w3"] + params["b3"]


if __name__ == "__main__":
    key = jax.random.PRNGKey(0)
    k_x, k_p = jax.random.split(key)

    batch, input_dim = 16, 8  # small tabular-MLP shapes; N is padded internally
    x = jax.random.normal(k_x, (batch, input_dim), dtype=jnp.float32)
    params = init_params(k_p, input_dim)

    out = bike_volume_nn_forward(x, params)
    out = jax.block_until_ready(out)

    ref = reference_forward(x, params)
    assert out.shape == (batch, 1)
    # Data stays f32 end-to-end; only MXU multiplicand rounding remains, so the
    # tolerance is tightened vs the previous bf16-input version.
    assert jnp.allclose(out, ref, atol=2e-2, rtol=2e-2), "mismatch vs reference"

    print("KERNEL_OK")
</pallas_src>

<mosaic_0001>
module attributes {stable_mosaic.version = 11 : i64} {
  func.func @_mlp_kernel(%arg0: i32, %arg1: memref<8x2048xf32, #tpu.memory_space<vmem>>, %arg2: memref<32x8xf32, #tpu.memory_space<vmem>>, %arg3: memref<32x1xf32, #tpu.memory_space<vmem>>, %arg4: memref<16x32xf32, #tpu.memory_space<vmem>>, %arg5: memref<16x1xf32, #tpu.memory_space<vmem>>, %arg6: memref<16x1xf32, #tpu.memory_space<vmem>>, %arg7: memref<1x1xf32, #tpu.memory_space<vmem>>, %arg8: memref<16x128xf32, #tpu.memory_space<vmem>>) attributes {dimension_semantics = [#tpu.dimension_semantics<parallel>], iteration_bounds = array<i64: 1>, scalar_prefetch = 0 : i64, scratch_operands = 0 : i64, tpu.core_type = #tpu.core_type<tc>, window_params = [{transform_indices = @transform_0, window_bounds = array<i64: 8, 2048>}, {pipeline_mode = #tpu.pipeline_mode<synchronous>, transform_indices = @transform_1, window_bounds = array<i64: 32, 8>}, {pipeline_mode = #tpu.pipeline_mode<synchronous>, transform_indices = @transform_2, window_bounds = array<i64: 32, 1>}, {pipeline_mode = #tpu.pipeline_mode<synchronous>, transform_indices = @transform_3, window_bounds = array<i64: 16, 32>}, {pipeline_mode = #tpu.pipeline_mode<synchronous>, transform_indices = @transform_4, window_bounds = array<i64: 16, 1>}, {pipeline_mode = #tpu.pipeline_mode<synchronous>, transform_indices = @transform_5, window_bounds = array<i64: 16, 1>}, {pipeline_mode = #tpu.pipeline_mode<synchronous>, transform_indices = @transform_6, window_bounds = array<i64: 1, 1>}, {transform_indices = @transform_7, window_bounds = array<i64: 16, 128>}]} {
    %c0 = arith.constant 0 : index
    %c0_0 = arith.constant 0 : index
    %0 = vector.load %arg2[%c0, %c0_0] : memref<32x8xf32, #tpu.memory_space<vmem>>, vector<32x8xf32>
    %c0_1 = arith.constant 0 : index
    %c0_2 = arith.constant 0 : index
    %1 = vector.load %arg3[%c0_1, %c0_2] : memref<32x1xf32, #tpu.memory_space<vmem>>, vector<32x1xf32>
    %c0_3 = arith.constant 0 : index
    %c0_4 = arith.constant 0 : index
    %2 = vector.load %arg4[%c0_3, %c0_4] : memref<16x32xf32, #tpu.memory_space<vmem>>, vector<16x32xf32>
    %c0_5 = arith.constant 0 : index
    %c0_6 = arith.constant 0 : index
    %3 = vector.load %arg5[%c0_5, %c0_6] : memref<16x1xf32, #tpu.memory_space<vmem>>, vector<16x1xf32>
    %c0_7 = arith.constant 0 : index
    %c0_8 = arith.constant 0 : index
    %4 = vector.load %arg6[%c0_7, %c0_8] : memref<16x1xf32, #tpu.memory_space<vmem>>, vector<16x1xf32>
    %c0_9 = arith.constant 0 : index
    %c0_10 = arith.constant 0 : index
    %5 = vector.load %arg7[%c0_9, %c0_10] : memref<1x1xf32, #tpu.memory_space<vmem>>, vector<1x1xf32>
    %c0_11 = arith.constant 0 : index
    %c0_12 = arith.constant 0 : index
    %6 = vector.load %arg1[%c0_11, %c0_12] : memref<8x2048xf32, #tpu.memory_space<vmem>>, vector<8x128xf32>
    %cst = arith.constant dense<0.000000e+00> : vector<32x128xf32>
    %7 = tpu.matmul %0, %6, %cst {dimension_numbers = #tpu.dot_dimension_numbers<[1], [0], [0], [1], [0, 0, 1, 1], [], []>} : vector<32x8xf32>, vector<8x128xf32>, vector<32x128xf32> -> vector<32x128xf32>
    %8 = vector.broadcast %1 : vector<32x1xf32> to vector<32x128xf32>
    %9 = arith.addf %7, %8 : vector<32x128xf32>
    %cst_13 = arith.constant 0.000000e+00 : f32
    %10 = vector.broadcast %cst_13 : f32 to vector<32x128xf32>
    %11 = arith.maximumf %9, %10 : vector<32x128xf32>
    %cst_14 = arith.constant dense<0.000000e+00> : vector<16x128xf32>
    %12 = tpu.matmul %2, %11, %cst_14 {dimension_numbers = #tpu.dot_dimension_numbers<[1], [0], [0], [1], [0, 0, 1, 1], [], []>} : vector<16x32xf32>, vector<32x128xf32>, vector<16x128xf32> -> vector<16x128xf32>
    %13 = vector.broadcast %3 : vector<16x1xf32> to vector<16x128xf32>
    %14 = arith.addf %12, %13 : vector<16x128xf32>
    %cst_15 = arith.constant 0.000000e+00 : f32
    %15 = vector.broadcast %cst_15 : f32 to vector<16x128xf32>
    %16 = arith.maximumf %14, %15 : vector<16x128xf32>
    %17 = vector.broadcast %4 : vector<16x1xf32> to vector<16x128xf32>
    %18 = arith.mulf %16, %17 : vector<16x128xf32>
    %cst_16 = arith.constant dense<0.000000e+00> : vector<128xf32>
    %19 = vector.multi_reduction <add>, %18, %cst_16 [0] : vector<16x128xf32> to vector<128xf32>
    %20 = vector.shape_cast %19 : vector<128xf32> to vector<1x128xf32>
    %21 = vector.broadcast %5 : vector<1x1xf32> to vector<1x128xf32>
    %22 = arith.addf %20, %21 : vector<1x128xf32>
    %c0_17 = arith.constant 0 : index
    %c0_18 = arith.constant 0 : index
    %23 = vector.load %arg8[%c0_17, %c0_18] : memref<16x128xf32, #tpu.memory_space<vmem>>, vector<1x128xf32>
    tpu.vector_store %arg8[%c0_17, %c0_18], %22 {strides = array<i32>} : memref<16x128xf32, #tpu.memory_space<vmem>>, vector<1x128xf32>,
    %c0_19 = arith.constant 0 : index
    %c128 = arith.constant 128 : index
    %24 = vector.load %arg1[%c0_19, %c128] : memref<8x2048xf32, #tpu.memory_space<vmem>>, vector<8x128xf32>
    %cst_20 = arith.constant dense<0.000000e+00> : vector<32x128xf32>
    %25 = tpu.matmul %0, %24, %cst_20 {dimension_numbers = #tpu.dot_dimension_numbers<[1], [0], [0], [1], [0, 0, 1, 1], [], []>} : vector<32x8xf32>, vector<8x128xf32>, vector<32x128xf32> -> vector<32x128xf32>
    %26 = vector.broadcast %1 : vector<32x1xf32> to vector<32x128xf32>
    %27 = arith.addf %25, %26 : vector<32x128xf32>
    %cst_21 = arith.constant 0.000000e+00 : f32
    %28 = vector.broadcast %cst_21 : f32 to vector<32x128xf32>
    %29 = arith.maximumf %27, %28 : vector<32x128xf32>
    %cst_22 = arith.constant dense<0.000000e+00> : vector<16x128xf32>
    %30 = tpu.matmul %2, %29, %cst_22 {dimension_numbers = #tpu.dot_dimension_numbers<[1], [0], [0], [1], [0, 0, 1, 1], [], []>} : vector<16x32xf32>, vector<32x128xf32>, vector<16x128xf32> -> vector<16x128xf32>
    %31 = vector.broadcast %3 : vector<16x1xf32> to vector<16x128xf32>
    %32 = arith.addf %30, %31 : vector<16x128xf32>
    %cst_23 = arith.constant 0.000000e+00 : f32
    %33 = vector.broadcast %cst_23 : f32 to vector<16x128xf32>
    %34 = arith.maximumf %32, %33 : vector<16x128xf32>
    %35 = vector.broadcast %4 : vector<16x1xf32> to vector<16x128xf32>
    %36 = arith.mulf %34, %35 : vector<16x128xf32>
    %cst_24 = arith.constant dense<0.000000e+00> : vector<128xf32>
    %37 = vector.multi_reduction <add>, %36, %cst_24 [0] : vector<16x128xf32> to vector<128xf32>
    %38 = vector.shape_cast %37 : vector<128xf32> to vector<1x128xf32>
    %39 = vector.broadcast %5 : vector<1x1xf32> to vector<1x128xf32>
    %40 = arith.addf %38, %39 : vector<1x128xf32>
    %c1 = arith.constant 1 : index
    %c0_25 = arith.constant 0 : index
    %41 = vector.load %arg8[%c1, %c0_25] : memref<16x128xf32, #tpu.memory_space<vmem>>, vector<1x128xf32>
    tpu.vector_store %arg8[%c1, %c0_25], %40 {strides = array<i32>} : memref<16x128xf32, #tpu.memory_space<vmem>>, vector<1x128xf32>,
    %c0_26 = arith.constant 0 : index
    %c256 = arith.constant 256 : index
    %42 = vector.load %arg1[%c0_26, %c256] : memref<8x2048xf32, #tpu.memory_space<vmem>>, vector<8x128xf32>
    %cst_27 = arith.constant dense<0.000000e+00> : vector<32x128xf32>
    %43 = tpu.matmul %0, %42, %cst_27 {dimension_numbers = #tpu.dot_dimension_numbers<[1], [0], [0], [1], [0, 0, 1, 1], [], []>} : vector<32x8xf32>, vector<8x128xf32>, vector<32x128xf32> -> vector<32x128xf32>
    %44 = vector.broadcast %1 : vector<32x1xf32> to vector<32x128xf32>
    %45 = arith.addf %43, %44 : vector<32x128xf32>
    %cst_28 = arith.constant 0.000000e+00 : f32
    %46 = vector.broadcast %cst_28 : f32 to vector<32x128xf32>
    %47 = arith.maximumf %45, %46 : vector<32x128xf32>
    %cst_29 = arith.constant dense<0.000000e+00> : vector<16x128xf32>
    %48 = tpu.matmul %2, %47, %cst_29 {dimension_numbers = #tpu.dot_dimension_numbers<[1], [0], [0], [1], [0, 0, 1, 1], [], []>} : vector<16x32xf32>, vector<32x128xf32>, vector<16x128xf32> -> vector<16x128xf32>
    %49 = vector.broadcast %3 : vector<16x1xf32> to vector<16x128xf32>
    %50 = arith.addf %48, %49 : vector<16x128xf32>
    %cst_30 = arith.constant 0.000000e+00 : f32
    %51 = vector.broadcast %cst_30 : f32 to vector<16x128xf32>
    %52 = arith.maximumf %50, %51 : vector<16x128xf32>
    %53 = vector.broadcast %4 : vector<16x1xf32> to vector<16x128xf32>
    %54 = arith.mulf %52, %53 : vector<16x128xf32>
    %cst_31 = arith.constant dense<0.000000e+00> : vector<128xf32>
    %55 = vector.multi_reduction <add>, %54, %cst_31 [0] : vector<16x128xf32> to vector<128xf32>
    %56 = vector.shape_cast %55 : vector<128xf32> to vector<1x128xf32>
    %57 = vector.broadcast %5 : vector<1x1xf32> to vector<1x128xf32>
    %58 = arith.addf %56, %57 : vector<1x128xf32>
    %c2 = arith.constant 2 : index
    %c0_32 = arith.constant 0 : index
    %59 = vector.load %arg8[%c2, %c0_32] : memref<16x128xf32, #tpu.memory_space<vmem>>, vector<1x128xf32>
    tpu.vector_store %arg8[%c2, %c0_32], %58 {strides = array<i32>} : memref<16x128xf32, #tpu.memory_space<vmem>>, vector<1x128xf32>,
    %c0_33 = arith.constant 0 : index
    %c384 = arith.constant 384 : index
    %60 = vector.load %arg1[%c0_33, %c384] : memref<8x2048xf32, #tpu.memory_space<vmem>>, vector<8x128xf32>
    %cst_34 = arith.constant dense<0.000000e+00> : vector<32x128xf32>
    %61 = tpu.matmul %0, %60, %cst_34 {dimension_numbers = #tpu.dot_dimension_numbers<[1], [0], [0], [1], [0, 0, 1, 1], [], []>} : vector<32x8xf32>, vector<8x128xf32>, vector<32x128xf32> -> vector<32x128xf32>
    %62 = vector.broadcast %1 : vector<32x1xf32> to vector<32x128xf32>
    %63 = arith.addf %61, %62 : vector<32x128xf32>
    %cst_35 = arith.constant 0.000000e+00 : f32
    %64 = vector.broadcast %cst_35 : f32 to vector<32x128xf32>
    %65 = arith.maximumf %63, %64 : vector<32x128xf32>
    %cst_36 = arith.constant dense<0.000000e+00> : vector<16x128xf32>
    %66 = tpu.matmul %2, %65, %cst_36 {dimension_numbers = #tpu.dot_dimension_numbers<[1], [0], [0], [1], [0, 0, 1, 1], [], []>} : vector<16x32xf32>, vector<32x128xf32>, vector<16x128xf32> -> vector<16x128xf32>
    %67 = vector.broadcast %3 : vector<16x1xf32> to vector<16x128xf32>
    %68 = arith.addf %66, %67 : vector<16x128xf32>
    %cst_37 = arith.constant 0.000000e+00 : f32
    %69 = vector.broadcast %cst_37 : f32 to vector<16x128xf32>
    %70 = arith.maximumf %68, %69 : vector<16x128xf32>
    %71 = vector.broadcast %4 : vector<16x1xf32> to vector<16x128xf32>
    %72 = arith.mulf %70, %71 : vector<16x128xf32>
    %cst_38 = arith.constant dense<0.000000e+00> : vector<128xf32>
    %73 = vector.multi_reduction <add>, %72, %cst_38 [0] : vector<16x128xf32> to vector<128xf32>
    %74 = vector.shape_cast %73 : vector<128xf32> to vector<1x128xf32>
    %75 = vector.broadcast %5 : vector<1x1xf32> to vector<1x128xf32>
    %76 = arith.addf %74, %75 : vector<1x128xf32>
    %c3 = arith.constant 3 : index
    %c0_39 = arith.constant 0 : index
    %77 = vector.load %arg8[%c3, %c0_39] : memref<16x128xf32, #tpu.memory_space<vmem>>, vector<1x128xf32>
    tpu.vector_store %arg8[%c3, %c0_39], %76 {strides = array<i32>} : memref<16x128xf32, #tpu.memory_space<vmem>>, vector<1x128xf32>,
    %c0_40 = arith.constant 0 : index
    %c512 = arith.constant 512 : index
    %78 = vector.load %arg1[%c0_40, %c512] : memref<8x2048xf32, #tpu.memory_space<vmem>>, vector<8x128xf32>
    %cst_41 = arith.constant dense<0.000000e+00> : vector<32x128xf32>
    %79 = tpu.matmul %0, %78, %cst_41 {dimension_numbers = #tpu.dot_dimension_numbers<[1], [0], [0], [1], [0, 0, 1, 1], [], []>} : vector<32x8xf32>, vector<8x128xf32>, vector<32x128xf32> -> vector<32x128xf32>
    %80 = vector.broadcast %1 : vector<32x1xf32> to vector<32x128xf32>
    %81 = arith.addf %79, %80 : vector<32x128xf32>
    %cst_42 = arith.constant 0.000000e+00 : f32
    %82 = vector.broadcast %cst_42 : f32 to vector<32x128xf32>
    %83 = arith.maximumf %81, %82 : vector<32x128xf32>
    %cst_43 = arith.constant dense<0.000000e+00> : vector<16x128xf32>
    %84 = tpu.matmul %2, %83, %cst_43 {dimension_numbers = #tpu.dot_dimension_numbers<[1], [0], [0], [1], [0, 0, 1, 1], [], []>} : vector<16x32xf32>, vector<32x128xf32>, vector<16x128xf32> -> vector<16x128xf32>
    %85 = vector.broadcast %3 : vector<16x1xf32> to vector<16x128xf32>
    %86 = arith.addf %84, %85 : vector<16x128xf32>
    %cst_44 = arith.constant 0.000000e+00 : f32
    %87 = vector.broadcast %cst_44 : f32 to vector<16x128xf32>
    %88 = arith.maximumf %86, %87 : vector<16x128xf32>
    %89 = vector.broadcast %4 : vector<16x1xf32> to vector<16x128xf32>
    %90 = arith.mulf %88, %89 : vector<16x128xf32>
    %cst_45 = arith.constant dense<0.000000e+00> : vector<128xf32>
    %91 = vector.multi_reduction <add>, %90, %cst_45 [0] : vector<16x128xf32> to vector<128xf32>
    %92 = vector.shape_cast %91 : vector<128xf32> to vector<1x128xf32>
    %93 = vector.broadcast %5 : vector<1x1xf32> to vector<1x128xf32>
    %94 = arith.addf %92, %93 : vector<1x128xf32>
    %c4 = arith.constant 4 : index
    %c0_46 = arith.constant 0 : index
    %95 = vector.load %arg8[%c4, %c0_46] : memref<16x128xf32, #tpu.memory_space<vmem>>, vector<1x128xf32>
    tpu.vector_store %arg8[%c4, %c0_46], %94 {strides = array<i32>} : memref<16x128xf32, #tpu.memory_space<vmem>>, vector<1x128xf32>,
    %c0_47 = arith.constant 0 : index
    %c640 = arith.constant 640 : index
    %96 = vector.load %arg1[%c0_47, %c640] : memref<8x2048xf32, #tpu.memory_space<vmem>>, vector<8x128xf32>
    %cst_48 = arith.constant dense<0.000000e+00> : vector<32x128xf32>
    %97 = tpu.matmul %0, %96, %cst_48 {dimension_numbers = #tpu.dot_dimension_numbers<[1], [0], [0], [1], [0, 0, 1, 1], [], []>} : vector<32x8xf32>, vector<8x128xf32>, vector<32x128xf32> -> vector<32x128xf32>
    %98 = vector.broadcast %1 : vector<32x1xf32> to vector<32x128xf32>
    %99 = arith.addf %97, %98 : vector<32x128xf32>
    %cst_49 = arith.constant 0.000000e+00 : f32
    %100 = vector.broadcast %cst_49 : f32 to vector<32x128xf32>
    %101 = arith.maximumf %99, %100 : vector<32x128xf32>
    %cst_50 = arith.constant dense<0.000000e+00> : vector<16x128xf32>
    %102 = tpu.matmul %2, %101, %cst_50 {dimension_numbers = #tpu.dot_dimension_numbers<[1], [0], [0], [1], [0, 0, 1, 1], [], []>} : vector<16x32xf32>, vector<32x128xf32>, vector<16x128xf32> -> vector<16x128xf32>
    %103 = vector.broadcast %3 : vector<16x1xf32> to vector<16x128xf32>
    %104 = arith.addf %102, %103 : vector<16x128xf32>
    %cst_51 = arith.constant 0.000000e+00 : f32
    %105 = vector.broadcast %cst_51 : f32 to vector<16x128xf32>
    %106 = arith.maximumf %104, %105 : vector<16x128xf32>
    %107 = vector.broadcast %4 : vector<16x1xf32> to vector<16x128xf32>
    %108 = arith.mulf %106, %107 : vector<16x128xf32>
    %cst_52 = arith.constant dense<0.000000e+00> : vector<128xf32>
    %109 = vector.multi_reduction <add>, %108, %cst_52 [0] : vector<16x128xf32> to vector<128xf32>
    %110 = vector.shape_cast %109 : vector<128xf32> to vector<1x128xf32>
    %111 = vector.broadcast %5 : vector<1x1xf32> to vector<1x128xf32>
    %112 = arith.addf %110, %111 : vector<1x128xf32>
    %c5 = arith.constant 5 : index
    %c0_53 = arith.constant 0 : index
    %113 = vector.load %arg8[%c5, %c0_53] : memref<16x128xf32, #tpu.memory_space<vmem>>, vector<1x128xf32>
    tpu.vector_store %arg8[%c5, %c0_53], %112 {strides = array<i32>} : memref<16x128xf32, #tpu.memory_space<vmem>>, vector<1x128xf32>,
    %c0_54 = arith.constant 0 : index
    %c768 = arith.constant 768 : index
    %114 = vector.load %arg1[%c0_54, %c768] : memref<8x2048xf32, #tpu.memory_space<vmem>>, vector<8x128xf32>
    %cst_55 = arith.constant dense<0.000000e+00> : vector<32x128xf32>
    %115 = tpu.matmul %0, %114, %cst_55 {dimension_numbers = #tpu.dot_dimension_numbers<[1], [0], [0], [1], [0, 0, 1, 1], [], []>} : vector<32x8xf32>, vector<8x128xf32>, vector<32x128xf32> -> vector<32x128xf32>
    %116 = vector.broadcast %1 : vector<32x1xf32> to vector<32x128xf32>
    %117 = arith.addf %115, %116 : vector<32x128xf32>
    %cst_56 = arith.constant 0.000000e+00 : f32
    %118 = vector.broadcast %cst_56 : f32 to vector<32x128xf32>
    %119 = arith.maximumf %117, %118 : vector<32x128xf32>
    %cst_57 = arith.constant dense<0.000000e+00> : vector<16x128xf32>
    %120 = tpu.matmul %2, %119, %cst_57 {dimension_numbers = #tpu.dot_dimension_numbers<[1], [0], [0], [1], [0, 0, 1, 1], [], []>} : vector<16x32xf32>, vector<32x128xf32>, vector<16x128xf32> -> vector<16x128xf32>
    %121 = vector.broadcast %3 : vector<16x1xf32> to vector<16x128xf32>
    %122 = arith.addf %120, %121 : vector<16x128xf32>
    %cst_58 = arith.constant 0.000000e+00 : f32
    %123 = vector.broadcast %cst_58 : f32 to vector<16x128xf32>
    %124 = arith.maximumf %122, %123 : vector<16x128xf32>
    %125 = vector.broadcast %4 : vector<16x1xf32> to vector<16x128xf32>
    %126 = arith.mulf %124, %125 : vector<16x128xf32>
    %cst_59 = arith.constant dense<0.000000e+00> : vector<128xf32>
    %127 = vector.multi_reduction <add>, %126, %cst_59 [0] : vector<16x128xf32> to vector<128xf32>
    %128 = vector.shape_cast %127 : vector<128xf32> to vector<1x128xf32>
    %129 = vector.broadcast %5 : vector<1x1xf32> to vector<1x128xf32>
    %130 = arith.addf %128, %129 : vector<1x128xf32>
    %c6 = arith.constant 6 : index
    %c0_60 = arith.constant 0 : index
    %131 = vector.load %arg8[%c6, %c0_60] : memref<16x128xf32, #tpu.memory_space<vmem>>, vector<1x128xf32>
    tpu.vector_store %arg8[%c6, %c0_60], %130 {strides = array<i32>} : memref<16x128xf32, #tpu.memory_space<vmem>>, vector<1x128xf32>,
    %c0_61 = arith.constant 0 : index
    %c896 = arith.constant 896 : index
    %132 = vector.load %arg1[%c0_61, %c896] : memref<8x2048xf32, #tpu.memory_space<vmem>>, vector<8x128xf32>
    %cst_62 = arith.constant dense<0.000000e+00> : vector<32x128xf32>
    %133 = tpu.matmul %0, %132, %cst_62 {dimension_numbers = #tpu.dot_dimension_numbers<[1], [0], [0], [1], [0, 0, 1, 1], [], []>} : vector<32x8xf32>, vector<8x128xf32>, vector<32x128xf32> -> vector<32x128xf32>
    %134 = vector.broadcast %1 : vector<32x1xf32> to vector<32x128xf32>
    %135 = arith.addf %133, %134 : vector<32x128xf32>
    %cst_63 = arith.constant 0.000000e+00 : f32
    %136 = vector.broadcast %cst_63 : f32 to vector<32x128xf32>
    %137 = arith.maximumf %135, %136 : vector<32x128xf32>
    %cst_64 = arith.constant dense<0.000000e+00> : vector<16x128xf32>
    %138 = tpu.matmul %2, %137, %cst_64 {dimension_numbers = #tpu.dot_dimension_numbers<[1], [0], [0], [1], [0, 0, 1, 1], [], []>} : vector<16x32xf32>, vector<32x128xf32>, vector<16x128xf32> -> vector<16x128xf32>
    %139 = vector.broadcast %3 : vector<16x1xf32> to vector<16x128xf32>
    %140 = arith.addf %138, %139 : vector<16x128xf32>
    %cst_65 = arith.constant 0.000000e+00 : f32
    %141 = vector.broadcast %cst_65 : f32 to vector<16x128xf32>
    %142 = arith.maximumf %140, %141 : vector<16x128xf32>
    %143 = vector.broadcast %4 : vector<16x1xf32> to vector<16x128xf32>
    %144 = arith.mulf %142, %143 : vector<16x128xf32>
    %cst_66 = arith.constant dense<0.000000e+00> : vector<128xf32>
    %145 = vector.multi_reduction <add>, %144, %cst_66 [0] : vector<16x128xf32> to vector<128xf32>
    %146 = vector.shape_cast %145 : vector<128xf32> to vector<1x128xf32>
    %147 = vector.broadcast %5 : vector<1x1xf32> to vector<1x128xf32>
    %148 = arith.addf %146, %147 : vector<1x128xf32>
    %c7 = arith.constant 7 : index
    %c0_67 = arith.constant 0 : index
    %149 = vector.load %arg8[%c7, %c0_67] : memref<16x128xf32, #tpu.memory_space<vmem>>, vector<1x128xf32>
    tpu.vector_store %arg8[%c7, %c0_67], %148 {strides = array<i32>} : memref<16x128xf32, #tpu.memory_space<vmem>>, vector<1x128xf32>,
    %c0_68 = arith.constant 0 : index
    %c1024 = arith.constant 1024 : index
    %150 = vector.load %arg1[%c0_68, %c1024] : memref<8x2048xf32, #tpu.memory_space<vmem>>, vector<8x128xf32>
    %cst_69 = arith.constant dense<0.000000e+00> : vector<32x128xf32>
    %151 = tpu.matmul %0, %150, %cst_69 {dimension_numbers = #tpu.dot_dimension_numbers<[1], [0], [0], [1], [0, 0, 1, 1], [], []>} : vector<32x8xf32>, vector<8x128xf32>, vector<32x128xf32> -> vector<32x128xf32>
    %152 = vector.broadcast %1 : vector<32x1xf32> to vector<32x128xf32>
    %153 = arith.addf %151, %152 : vector<32x128xf32>
    %cst_70 = arith.constant 0.000000e+00 : f32
    %154 = vector.broadcast %cst_70 : f32 to vector<32x128xf32>
    %155 = arith.maximumf %153, %154 : vector<32x128xf32>
    %cst_71 = arith.constant dense<0.000000e+00> : vector<16x128xf32>
    %156 = tpu.matmul %2, %155, %cst_71 {dimension_numbers = #tpu.dot_dimension_numbers<[1], [0], [0], [1], [0, 0, 1, 1], [], []>} : vector<16x32xf32>, vector<32x128xf32>, vector<16x128xf32> -> vector<16x128xf32>
    %157 = vector.broadcast %3 : vector<16x1xf32> to vector<16x128xf32>
    %158 = arith.addf %156, %157 : vector<16x128xf32>
    %cst_72 = arith.constant 0.000000e+00 : f32
    %159 = vector.broadcast %cst_72 : f32 to vector<16x128xf32>
    %160 = arith.maximumf %158, %159 : vector<16x128xf32>
    %161 = vector.broadcast %4 : vector<16x1xf32> to vector<16x128xf32>
    %162 = arith.mulf %160, %161 : vector<16x128xf32>
    %cst_73 = arith.constant dense<0.000000e+00> : vector<128xf32>
    %163 = vector.multi_reduction <add>, %162, %cst_73 [0] : vector<16x128xf32> to vector<128xf32>
    %164 = vector.shape_cast %163 : vector<128xf32> to vector<1x128xf32>
    %165 = vector.broadcast %5 : vector<1x1xf32> to vector<1x128xf32>
    %166 = arith.addf %164, %165 : vector<1x128xf32>
    %c8 = arith.constant 8 : index
    %c0_74 = arith.constant 0 : index
    %167 = vector.load %arg8[%c8, %c0_74] : memref<16x128xf32, #tpu.memory_space<vmem>>, vector<1x128xf32>
    tpu.vector_store %arg8[%c8, %c0_74], %166 {strides = array<i32>} : memref<16x128xf32, #tpu.memory_space<vmem>>, vector<1x128xf32>,
    %c0_75 = arith.constant 0 : index
    %c1152 = arith.constant 1152 : index
    %168 = vector.load %arg1[%c0_75, %c1152] : memref<8x2048xf32, #tpu.memory_space<vmem>>, vector<8x128xf32>
    %cst_76 = arith.constant dense<0.000000e+00> : vector<32x128xf32>
    %169 = tpu.matmul %0, %168, %cst_76 {dimension_numbers = #tpu.dot_dimension_numbers<[1], [0], [0], [1], [0, 0, 1, 1], [], []>} : vector<32x8xf32>, vector<8x128xf32>, vector<32x128xf32> -> vector<32x128xf32>
    %170 = vector.broadcast %1 : vector<32x1xf32> to vector<32x128xf32>
    %171 = arith.addf %169, %170 : vector<32x128xf32>
    %cst_77 = arith.constant 0.000000e+00 : f32
    %172 = vector.broadcast %cst_77 : f32 to vector<32x128xf32>
    %173 = arith.maximumf %171, %172 : vector<32x128xf32>
    %cst_78 = arith.constant dense<0.000000e+00> : vector<16x128xf32>
    %174 = tpu.matmul %2, %173, %cst_78 {dimension_numbers = #tpu.dot_dimension_numbers<[1], [0], [0], [1], [0, 0, 1, 1], [], []>} : vector<16x32xf32>, vector<32x128xf32>, vector<16x128xf32> -> vector<16x128xf32>
    %175 = vector.broadcast %3 : vector<16x1xf32> to vector<16x128xf32>
    %176 = arith.addf %174, %175 : vector<16x128xf32>
    %cst_79 = arith.constant 0.000000e+00 : f32
    %177 = vector.broadcast %cst_79 : f32 to vector<16x128xf32>
    %178 = arith.maximumf %176, %177 : vector<16x128xf32>
    %179 = vector.broadcast %4 : vector<16x1xf32> to vector<16x128xf32>
    %180 = arith.mulf %178, %179 : vector<16x128xf32>
    %cst_80 = arith.constant dense<0.000000e+00> : vector<128xf32>
    %181 = vector.multi_reduction <add>, %180, %cst_80 [0] : vector<16x128xf32> to vector<128xf32>
    %182 = vector.shape_cast %181 : vector<128xf32> to vector<1x128xf32>
    %183 = vector.broadcast %5 : vector<1x1xf32> to vector<1x128xf32>
    %184 = arith.addf %182, %183 : vector<1x128xf32>
    %c9 = arith.constant 9 : index
    %c0_81 = arith.constant 0 : index
    %185 = vector.load %arg8[%c9, %c0_81] : memref<16x128xf32, #tpu.memory_space<vmem>>, vector<1x128xf32>
    tpu.vector_store %arg8[%c9, %c0_81], %184 {strides = array<i32>} : memref<16x128xf32, #tpu.memory_space<vmem>>, vector<1x128xf32>,
    %c0_82 = arith.constant 0 : index
    %c1280 = arith.constant 1280 : index
    %186 = vector.load %arg1[%c0_82, %c1280] : memref<8x2048xf32, #tpu.memory_space<vmem>>, vector<8x128xf32>
    %cst_83 = arith.constant dense<0.000000e+00> : vector<32x128xf32>
    %187 = tpu.matmul %0, %186, %cst_83 {dimension_numbers = #tpu.dot_dimension_numbers<[1], [0], [0], [1], [0, 0, 1, 1], [], []>} : vector<32x8xf32>, vector<8x128xf32>, vector<32x128xf32> -> vector<32x128xf32>
    %188 = vector.broadcast %1 : vector<32x1xf32> to vector<32x128xf32>
    %189 = arith.addf %187, %188 : vector<32x128xf32>
    %cst_84 = arith.constant 0.000000e+00 : f32
    %190 = vector.broadcast %cst_84 : f32 to vector<32x128xf32>
    %191 = arith.maximumf %189, %190 : vector<32x128xf32>
    %cst_85 = arith.constant dense<0.000000e+00> : vector<16x128xf32>
    %192 = tpu.matmul %2, %191, %cst_85 {dimension_numbers = #tpu.dot_dimension_numbers<[1], [0], [0], [1], [0, 0, 1, 1], [], []>} : vector<16x32xf32>, vector<32x128xf32>, vector<16x128xf32> -> vector<16x128xf32>
    %193 = vector.broadcast %3 : vector<16x1xf32> to vector<16x128xf32>
    %194 = arith.addf %192, %193 : vector<16x128xf32>
    %cst_86 = arith.constant 0.000000e+00 : f32
    %195 = vector.broadcast %cst_86 : f32 to vector<16x128xf32>
    %196 = arith.maximumf %194, %195 : vector<16x128xf32>
    %197 = vector.broadcast %4 : vector<16x1xf32> to vector<16x128xf32>
    %198 = arith.mulf %196, %197 : vector<16x128xf32>
    %cst_87 = arith.constant dense<0.000000e+00> : vector<128xf32>
    %199 = vector.multi_reduction <add>, %198, %cst_87 [0] : vector<16x128xf32> to vector<128xf32>
    %200 = vector.shape_cast %199 : vector<128xf32> to vector<1x128xf32>
    %201 = vector.broadcast %5 : vector<1x1xf32> to vector<1x128xf32>
    %202 = arith.addf %200, %201 : vector<1x128xf32>
    %c10 = arith.constant 10 : index
    %c0_88 = arith.constant 0 : index
    %203 = vector.load %arg8[%c10, %c0_88] : memref<16x128xf32, #tpu.memory_space<vmem>>, vector<1x128xf32>
    tpu.vector_store %arg8[%c10, %c0_88], %202 {strides = array<i32>} : memref<16x128xf32, #tpu.memory_space<vmem>>, vector<1x128xf32>,
    %c0_89 = arith.constant 0 : index
    %c1408 = arith.constant 1408 : index
    %204 = vector.load %arg1[%c0_89, %c1408] : memref<8x2048xf32, #tpu.memory_space<vmem>>, vector<8x128xf32>
    %cst_90 = arith.constant dense<0.000000e+00> : vector<32x128xf32>
    %205 = tpu.matmul %0, %204, %cst_90 {dimension_numbers = #tpu.dot_dimension_numbers<[1], [0], [0], [1], [0, 0, 1, 1], [], []>} : vector<32x8xf32>, vector<8x128xf32>, vector<32x128xf32> -> vector<32x128xf32>
    %206 = vector.broadcast %1 : vector<32x1xf32> to vector<32x128xf32>
    %207 = arith.addf %205, %206 : vector<32x128xf32>
    %cst_91 = arith.constant 0.000000e+00 : f32
    %208 = vector.broadcast %cst_91 : f32 to vector<32x128xf32>
    %209 = arith.maximumf %207, %208 : vector<32x128xf32>
    %cst_92 = arith.constant dense<0.000000e+00> : vector<16x128xf32>
    %210 = tpu.matmul %2, %209, %cst_92 {dimension_numbers = #tpu.dot_dimension_numbers<[1], [0], [0], [1], [0, 0, 1, 1], [], []>} : vector<16x32xf32>, vector<32x128xf32>, vector<16x128xf32> -> vector<16x128xf32>
    %211 = vector.broadcast %3 : vector<16x1xf32> to vector<16x128xf32>
    %212 = arith.addf %210, %211 : vector<16x128xf32>
    %cst_93 = arith.constant 0.000000e+00 : f32
    %213 = vector.broadcast %cst_93 : f32 to vector<16x128xf32>
    %214 = arith.maximumf %212, %213 : vector<16x128xf32>
    %215 = vector.broadcast %4 : vector<16x1xf32> to vector<16x128xf32>
    %216 = arith.mulf %214, %215 : vector<16x128xf32>
    %cst_94 = arith.constant dense<0.000000e+00> : vector<128xf32>
    %217 = vector.multi_reduction <add>, %216, %cst_94 [0] : vector<16x128xf32> to vector<128xf32>
    %218 = vector.shape_cast %217 : vector<128xf32> to vector<1x128xf32>
    %219 = vector.broadcast %5 : vector<1x1xf32> to vector<1x128xf32>
    %220 = arith.addf %218, %219 : vector<1x128xf32>
    %c11 = arith.constant 11 : index
    %c0_95 = arith.constant 0 : index
    %221 = vector.load %arg8[%c11, %c0_95] : memref<16x128xf32, #tpu.memory_space<vmem>>, vector<1x128xf32>
    tpu.vector_store %arg8[%c11, %c0_95], %220 {strides = array<i32>} : memref<16x128xf32, #tpu.memory_space<vmem>>, vector<1x128xf32>,
    %c0_96 = arith.constant 0 : index
    %c1536 = arith.constant 1536 : index
    %222 = vector.load %arg1[%c0_96, %c1536] : memref<8x2048xf32, #tpu.memory_space<vmem>>, vector<8x128xf32>
    %cst_97 = arith.constant dense<0.000000e+00> : vector<32x128xf32>
    %223 = tpu.matmul %0, %222, %cst_97 {dimension_numbers = #tpu.dot_dimension_numbers<[1], [0], [0], [1], [0, 0, 1, 1], [], []>} : vector<32x8xf32>, vector<8x128xf32>, vector<32x128xf32> -> vector<32x128xf32>
    %224 = vector.broadcast %1 : vector<32x1xf32> to vector<32x128xf32>
    %225 = arith.addf %223, %224 : vector<32x128xf32>
    %cst_98 = arith.constant 0.000000e+00 : f32
    %226 = vector.broadcast %cst_98 : f32 to vector<32x128xf32>
    %227 = arith.maximumf %225, %226 : vector<32x128xf32>
    %cst_99 = arith.constant dense<0.000000e+00> : vector<16x128xf32>
    %228 = tpu.matmul %2, %227, %cst_99 {dimension_numbers = #tpu.dot_dimension_numbers<[1], [0], [0], [1], [0, 0, 1, 1], [], []>} : vector<16x32xf32>, vector<32x128xf32>, vector<16x128xf32> -> vector<16x128xf32>
    %229 = vector.broadcast %3 : vector<16x1xf32> to vector<16x128xf32>
    %230 = arith.addf %228, %229 : vector<16x128xf32>
    %cst_100 = arith.constant 0.000000e+00 : f32
    %231 = vector.broadcast %cst_100 : f32 to vector<16x128xf32>
    %232 = arith.maximumf %230, %231 : vector<16x128xf32>
    %233 = vector.broadcast %4 : vector<16x1xf32> to vector<16x128xf32>
    %234 = arith.mulf %232, %233 : vector<16x128xf32>
    %cst_101 = arith.constant dense<0.000000e+00> : vector<128xf32>
    %235 = vector.multi_reduction <add>, %234, %cst_101 [0] : vector<16x128xf32> to vector<128xf32>
    %236 = vector.shape_cast %235 : vector<128xf32> to vector<1x128xf32>
    %237 = vector.broadcast %5 : vector<1x1xf32> to vector<1x128xf32>
    %238 = arith.addf %236, %237 : vector<1x128xf32>
    %c12 = arith.constant 12 : index
    %c0_102 = arith.constant 0 : index
    %239 = vector.load %arg8[%c12, %c0_102] : memref<16x128xf32, #tpu.memory_space<vmem>>, vector<1x128xf32>
    tpu.vector_store %arg8[%c12, %c0_102], %238 {strides = array<i32>} : memref<16x128xf32, #tpu.memory_space<vmem>>, vector<1x128xf32>,
    %c0_103 = arith.constant 0 : index
    %c1664 = arith.constant 1664 : index
    %240 = vector.load %arg1[%c0_103, %c1664] : memref<8x2048xf32, #tpu.memory_space<vmem>>, vector<8x128xf32>
    %cst_104 = arith.constant dense<0.000000e+00> : vector<32x128xf32>
    %241 = tpu.matmul %0, %240, %cst_104 {dimension_numbers = #tpu.dot_dimension_numbers<[1], [0], [0], [1], [0, 0, 1, 1], [], []>} : vector<32x8xf32>, vector<8x128xf32>, vector<32x128xf32> -> vector<32x128xf32>
    %242 = vector.broadcast %1 : vector<32x1xf32> to vector<32x128xf32>
    %243 = arith.addf %241, %242 : vector<32x128xf32>
    %cst_105 = arith.constant 0.000000e+00 : f32
    %244 = vector.broadcast %cst_105 : f32 to vector<32x128xf32>
    %245 = arith.maximumf %243, %244 : vector<32x128xf32>
    %cst_106 = arith.constant dense<0.000000e+00> : vector<16x128xf32>
    %246 = tpu.matmul %2, %245, %cst_106 {dimension_numbers = #tpu.dot_dimension_numbers<[1], [0], [0], [1], [0, 0, 1, 1], [], []>} : vector<16x32xf32>, vector<32x128xf32>, vector<16x128xf32> -> vector<16x128xf32>
    %247 = vector.broadcast %3 : vector<16x1xf32> to vector<16x128xf32>
    %248 = arith.addf %246, %247 : vector<16x128xf32>
    %cst_107 = arith.constant 0.000000e+00 : f32
    %249 = vector.broadcast %cst_107 : f32 to vector<16x128xf32>
    %250 = arith.maximumf %248, %249 : vector<16x128xf32>
    %251 = vector.broadcast %4 : vector<16x1xf32> to vector<16x128xf32>
    %252 = arith.mulf %250, %251 : vector<16x128xf32>
    %cst_108 = arith.constant dense<0.000000e+00> : vector<128xf32>
    %253 = vector.multi_reduction <add>, %252, %cst_108 [0] : vector<16x128xf32> to vector<128xf32>
    %254 = vector.shape_cast %253 : vector<128xf32> to vector<1x128xf32>
    %255 = vector.broadcast %5 : vector<1x1xf32> to vector<1x128xf32>
    %256 = arith.addf %254, %255 : vector<1x128xf32>
    %c13 = arith.constant 13 : index
    %c0_109 = arith.constant 0 : index
    %257 = vector.load %arg8[%c13, %c0_109] : memref<16x128xf32, #tpu.memory_space<vmem>>, vector<1x128xf32>
    tpu.vector_store %arg8[%c13, %c0_109], %256 {strides = array<i32>} : memref<16x128xf32, #tpu.memory_space<vmem>>, vector<1x128xf32>,
    %c0_110 = arith.constant 0 : index
    %c1792 = arith.constant 1792 : index
    %258 = vector.load %arg1[%c0_110, %c1792] : memref<8x2048xf32, #tpu.memory_space<vmem>>, vector<8x128xf32>
    %cst_111 = arith.constant dense<0.000000e+00> : vector<32x128xf32>
    %259 = tpu.matmul %0, %258, %cst_111 {dimension_numbers = #tpu.dot_dimension_numbers<[1], [0], [0], [1], [0, 0, 1, 1], [], []>} : vector<32x8xf32>, vector<8x128xf32>, vector<32x128xf32> -> vector<32x128xf32>
    %260 = vector.broadcast %1 : vector<32x1xf32> to vector<32x128xf32>
    %261 = arith.addf %259, %260 : vector<32x128xf32>
    %cst_112 = arith.constant 0.000000e+00 : f32
    %262 = vector.broadcast %cst_112 : f32 to vector<32x128xf32>
    %263 = arith.maximumf %261, %262 : vector<32x128xf32>
    %cst_113 = arith.constant dense<0.000000e+00> : vector<16x128xf32>
    %264 = tpu.matmul %2, %263, %cst_113 {dimension_numbers = #tpu.dot_dimension_numbers<[1], [0], [0], [1], [0, 0, 1, 1], [], []>} : vector<16x32xf32>, vector<32x128xf32>, vector<16x128xf32> -> vector<16x128xf32>
    %265 = vector.broadcast %3 : vector<16x1xf32> to vector<16x128xf32>
    %266 = arith.addf %264, %265 : vector<16x128xf32>
    %cst_114 = arith.constant 0.000000e+00 : f32
    %267 = vector.broadcast %cst_114 : f32 to vector<16x128xf32>
    %268 = arith.maximumf %266, %267 : vector<16x128xf32>
    %269 = vector.broadcast %4 : vector<16x1xf32> to vector<16x128xf32>
    %270 = arith.mulf %268, %269 : vector<16x128xf32>
    %cst_115 = arith.constant dense<0.000000e+00> : vector<128xf32>
    %271 = vector.multi_reduction <add>, %270, %cst_115 [0] : vector<16x128xf32> to vector<128xf32>
    %272 = vector.shape_cast %271 : vector<128xf32> to vector<1x128xf32>
    %273 = vector.broadcast %5 : vector<1x1xf32> to vector<1x128xf32>
    %274 = arith.addf %272, %273 : vector<1x128xf32>
    %c14 = arith.constant 14 : index
    %c0_116 = arith.constant 0 : index
    %275 = vector.load %arg8[%c14, %c0_116] : memref<16x128xf32, #tpu.memory_space<vmem>>, vector<1x128xf32>
    tpu.vector_store %arg8[%c14, %c0_116], %274 {strides = array<i32>} : memref<16x128xf32, #tpu.memory_space<vmem>>, vector<1x128xf32>,
    %c0_117 = arith.constant 0 : index
    %c1920 = arith.constant 1920 : index
    %276 = vector.load %arg1[%c0_117, %c1920] : memref<8x2048xf32, #tpu.memory_space<vmem>>, vector<8x128xf32>
    %cst_118 = arith.constant dense<0.000000e+00> : vector<32x128xf32>
    %277 = tpu.matmul %0, %276, %cst_118 {dimension_numbers = #tpu.dot_dimension_numbers<[1], [0], [0], [1], [0, 0, 1, 1], [], []>} : vector<32x8xf32>, vector<8x128xf32>, vector<32x128xf32> -> vector<32x128xf32>
    %278 = vector.broadcast %1 : vector<32x1xf32> to vector<32x128xf32>
    %279 = arith.addf %277, %278 : vector<32x128xf32>
    %cst_119 = arith.constant 0.000000e+00 : f32
    %280 = vector.broadcast %cst_119 : f32 to vector<32x128xf32>
    %281 = arith.maximumf %279, %280 : vector<32x128xf32>
    %cst_120 = arith.constant dense<0.000000e+00> : vector<16x128xf32>
    %282 = tpu.matmul %2, %281, %cst_120 {dimension_numbers = #tpu.dot_dimension_numbers<[1], [0], [0], [1], [0, 0, 1, 1], [], []>} : vector<16x32xf32>, vector<32x128xf32>, vector<16x128xf32> -> vector<16x128xf32>
    %283 = vector.broadcast %3 : vector<16x1xf32> to vector<16x128xf32>
    %284 = arith.addf %282, %283 : vector<16x128xf32>
    %cst_121 = arith.constant 0.000000e+00 : f32
    %285 = vector.broadcast %cst_121 : f32 to vector<16x128xf32>
    %286 = arith.maximumf %284, %285 : vector<16x128xf32>
    %287 = vector.broadcast %4 : vector<16x1xf32> to vector<16x128xf32>
    %288 = arith.mulf %286, %287 : vector<16x128xf32>
    %cst_122 = arith.constant dense<0.000000e+00> : vector<128xf32>
    %289 = vector.multi_reduction <add>, %288, %cst_122 [0] : vector<16x128xf32> to vector<128xf32>
    %290 = vector.shape_cast %289 : vector<128xf32> to vector<1x128xf32>
    %291 = vector.broadcast %5 : vector<1x1xf32> to vector<1x128xf32>
    %292 = arith.addf %290, %291 : vector<1x128xf32>
    %c15 = arith.constant 15 : index
    %c0_123 = arith.constant 0 : index
    %293 = vector.load %arg8[%c15, %c0_123] : memref<16x128xf32, #tpu.memory_space<vmem>>, vector<1x128xf32>
    tpu.vector_store %arg8[%c15, %c0_123], %292 {strides = array<i32>} : memref<16x128xf32, #tpu.memory_space<vmem>>, vector<1x128xf32>,
    return
  }
  func.func @transform_0(%arg0: i32) -> (i32, i32) {
    %c0_i32 = arith.constant 0 : i32
    %c0_i32_0 = arith.constant 0 : i32
    return %c0_i32, %arg0 : i32, i32
  }
  func.func @transform_1(%arg0: i32) -> (i32, i32) {
    %c0_i32 = arith.constant 0 : i32
    %c0_i32_0 = arith.constant 0 : i32
    %c0_i32_1 = arith.constant 0 : i32
    return %c0_i32, %c0_i32_0 : i32, i32
  }
  func.func @transform_2(%arg0: i32) -> (i32, i32) {
    %c0_i32 = arith.constant 0 : i32
    %c0_i32_0 = arith.constant 0 : i32
    %c0_i32_1 = arith.constant 0 : i32
    return %c0_i32, %c0_i32_0 : i32, i32
  }
  func.func @transform_3(%arg0: i32) -> (i32, i32) {
    %c0_i32 = arith.constant 0 : i32
    %c0_i32_0 = arith.constant 0 : i32
    %c0_i32_1 = arith.constant 0 : i32
    return %c0_i32, %c0_i32_0 : i32, i32
  }
  func.func @transform_4(%arg0: i32) -> (i32, i32) {
    %c0_i32 = arith.constant 0 : i32
    %c0_i32_0 = arith.constant 0 : i32
    %c0_i32_1 = arith.constant 0 : i32
    return %c0_i32, %c0_i32_0 : i32, i32
  }
  func.func @transform_5(%arg0: i32) -> (i32, i32) {
    %c0_i32 = arith.constant 0 : i32
    %c0_i32_0 = arith.constant 0 : i32
    %c0_i32_1 = arith.constant 0 : i32
    return %c0_i32, %c0_i32_0 : i32, i32
  }
  func.func @transform_6(%arg0: i32) -> (i32, i32) {
    %c0_i32 = arith.constant 0 : i32
    %c0_i32_0 = arith.constant 0 : i32
    %c0_i32_1 = arith.constant 0 : i32
    return %c0_i32, %c0_i32_0 : i32, i32
  }
  func.func @transform_7(%arg0: i32) -> (i32, i32) {
    %c0_i32 = arith.constant 0 : i32
    %c0_i32_0 = arith.constant 0 : i32
    return %arg0, %c0_i32 : i32, i32
  }
}

</mosaic_0001>

<bundles_post_ra>
// kernel: tpu_custom_call.1
= control target key start
LH: loop header
LB: loop body
LE: loop exit
PB: predicated region body
PF: predicated region fallthrough
CT: control target
= control target key end

     0   :  { %s1893_s0 = inlined_call_operand.hbm [shape: f32[8,2048], index: 0, kind: input, shape index: {}]   ;;  %s1894_s1 = inlined_call_operand.vmem [shape: f32[32,8], index: 1, kind: input, shape index: {}]   ;;  %s1895_s2 = inlined_call_operand.vmem [shape: f32[32,1], index: 2, kind: input, shape index: {}]   ;;  %s1896_s3 = inlined_call_operand.vmem [shape: f32[16,32], index: 3, kind: input, shape index: {}]   ;;  %s1897_s4 = inlined_call_operand.vmem [shape: f32[16,1], index: 4, kind: input, shape index: {}]   ;;  %s1898_s5 = inlined_call_operand.vmem [shape: f32[16,1], index: 5, kind: input, shape index: {}]   ;;  %s1899_s6 = inlined_call_operand.<no memory space> [shape: f32[1,1], index: 6, kind: input, shape index: {}]   ;;  %s1900_s7 = inlined_call_operand.hbm [shape: f32[16,128], index: 7, kind: output, shape index: {}]  }
   0x1   :  { %v12_v0 = vstv %s1899_s6 }
   0x2   :  { %13 = vst [vmem:[#allocation2] sm:$0x1] %v12_v0 }
   0x3   :  { %14 = vsyncpa [#allocation4], 0 }
   0x4   :  { %15 = vsyncpa [#allocation5], 0  ;;  %s21_s28 = sshll.u32 %s1893_s0, 4  ;;  %s1425_s29 = smov [#allocation3]   ;;  %s22_s28 = int_to_ptr.hbm [resolvable:$true] %s21_s28 }
   0x5   :  { %s23_s30 = sshll.u32 %s1425_s29, 4  ;;  %s24_s30 = int_to_ptr.vmem [resolvable:$true] %s23_s30 }
   0x6   :  { %26 = dma.hbm_to_vmem [thread:$0]  %s22_s28, 2048, %s24_s30, [#allocation4]  }
   0x7   :  { %1421 = dma.done.wait [#allocation4], 2048  }
   0x8   :  { %1422 = vsyncadd [#allocation4], 4294965248  ;;  %v1426_v1 = vmov 0   ;;  %vm79_vm0 = vcmask 64512   ;;  %v58_v2 = vld [vmem:[#allocation3] sm:$0xff]  ;;  %v194_v3 = vld [vmem:[#allocation3 + $0x8] sm:$0xff] }
   0x9   :  { %1365 = vset.pattern.permute.xlu1 %v1426_v1  ;;  %1364 = vset.pattern.permute.xlu0 %v1426_v1  ;;  %v1479_v4 = vld [vmem:[%s1894_s1] sm:$0xff]  ;;  %v48_v5 = vld [vmem:[%s1895_s2 + $0x8] sm:$0xff]  ;;  %v50_v6 = vld [vmem:[%s1895_s2 + $0x18] sm:$0xff]  ;;  %vm135_vm1 = vcmask 261120   ;;  %s1250_s20 = sshll.u32 %s1900_s7, 4  ;;  %s1428_s21 = smov 128   ;;  %s1251_s20 = int_to_ptr.hbm [resolvable:$true] %s1250_s20 }
   0xa   :  { %1366 = vset.pattern.permute.xlu2 %v1426_v1  ;;  %107 = vmatpush.msra.mxu0 %v58_v2  ;;  %v334_v7 = vld [vmem:[#allocation3 + $0x18] sm:$0xff]  ;;  %v1494_v8 = vld [vmem:[%s1894_s1 + $0x8] sm:$0xff]  ;;  %v49_v10 = vld [vmem:[%s1895_s2 + $0x10] sm:$0xff]  ;;  %s1429_s22 = smov 8  }
   0xb   :  { %210 = vmatpush.msra.mxu2 %v194_v3  ;;  %1263 = vmatmul.msk.f32.vlgmr.msra.gmra.mxu0 %vm79_vm0, %v1479_v4  ;;  %v47_v9 = vld [vmem:[%s1895_s2] sm:$0xff]  ;;  %v1509_v11 = vld [vmem:[%s1894_s1 + $0x10] sm:$0xff]  ;;  %v56_v13 = vld [vmem:[%s1898_s5 + $0x8] sm:$0xff] }
   0xc   :  { %1269 = vmatmul.msk.f32.vlgmr.msra.gmra.mxu2 %vm79_vm0, %v1479_v4  ;;  %66 = vperm.xlu1 %1365, %v48_v5   ;;  %v55_v12 = vld [vmem:[%s1898_s5] sm:$0xff]  ;;  %v1524_v14 = vld [vmem:[%s1894_s1 + $0x18] sm:$0xff]  ;;  %v1575_v49 = vld [vmem:[%s1896_s3 + $0x8] sm:$0xff] }
   0xd   :  { %76 = vperm.xlu0 %1364, %v50_v6   ;;  %350 = vmatpush.msrb.mxu0 %v334_v7  ;;  %v614_v15 = vld [vmem:[#allocation3 + $0x38] sm:$0xff]  ;;  %v264_v42 = vld [vmem:[#allocation3 + $0x10] sm:$0xff]  ;;  %v54_v50 = vld [vmem:[%s1897_s4 + $0x8] sm:$0xff] }
   0xe   :  { %v1564_v41 = vld [vmem:[%s1896_s3] sm:$0xff]  ;;  %v474_v52 = vld [vmem:[#allocation3 + $0x28] sm:$0xff] }
   0xf   :  { %630 = vmatpush.msra.mxu0 %v614_v15  ;;  %v53_v45 = vld [vmem:[%s1897_s4] sm:$0xff]  ;;  %v754_v15 = vld [vmem:[#allocation3 + $0x48] sm:$0xff] }
  0x10   :  { %127 = vperm.xlu2 %1366, %v53_v45   ;;  %v57_v61 = vld [vmem:[#allocation2] sm:$0x1] }
  0x13   :  { %1264 = vmatmul.msk.f32.gmra.mxu0 %vm79_vm0, %v1494_v8 }
  0x14   :  { %1270 = vmatmul.msk.f32.gmra.mxu2 %vm79_vm0, %v1494_v8  ;;  %61 = vperm.xlu1 %1365, %v47_v9  }
  0x15   :  { %71 = vperm.xlu0 %1364, %v49_v10  }
  0x18   :  { %132 = vperm.xlu2 %1366, %v54_v50  }
  0x1b   :  { %1265 = vmatmul.msk.f32.gmra.mxu0 %vm79_vm0, %v1509_v11 }
  0x1c   :  { %1271 = vmatmul.msk.f32.gmra.mxu2 %vm79_vm0, %v1509_v11  ;;  %174 = vperm.xlu1 %1365, %v56_v13  }
  0x1d   :  { %169 = vperm.xlu0 %1364, %v55_v12  }
  0x20   :  { %188 = vperm.xlu2 %1366, %v57_v61  }
  0x23   :  { %1266 = vmatmul.msk.f32.gmra.mxu0 %vm79_vm0, %v1524_v14 }
  0x24   :  { %1272 = vmatmul.msk.f32.gmra.mxu2 %vm79_vm0, %v1524_v14 }
  0x2b   :  { %1281 = vmatmul.msk.f32.vlgmr.msrb.gmra.mxu0 %vm79_vm0, %v1479_v4 }
  0x33   :  { %1282 = vmatmul.msk.f32.gmra.mxu0 %vm79_vm0, %v1494_v8 }
  0x3b   :  { %1283 = vmatmul.msk.f32.gmra.mxu0 %vm79_vm0, %v1509_v11 }
  0x43   :  { %1284 = vmatmul.msk.f32.gmra.mxu0 %vm79_vm0, %v1524_v14 }
  0x4b   :  { %1305 = vmatmul.msk.f32.vlgmr.msra.gmra.mxu0 %vm79_vm0, %v1479_v4 }
  0x53   :  { %1306 = vmatmul.msk.f32.gmra.mxu0 %vm79_vm0, %v1494_v8 }
  0x5b   :  { %1307 = vmatmul.msk.f32.gmra.mxu0 %vm79_vm0, %v1509_v11 }
  0x63   :  { %1308 = vmatmul.msk.f32.gmra.mxu0 %vm79_vm0, %v1524_v14 }
  0x7e   :  { %v1548_v21 = vpop.permute.xlu1 %66 }
  0x7f   :  { %v1546_v19 = vpop.permute.xlu0 %76 }
  0x86   :  { %v1554_v28 = vpop.permute.xlu1 %61 }
  0x87   :  { %v1550_v24 = vpop.permute.xlu0 %71 }
  0x88   :  { %v109_v16 = vpop.f32.mrf.mxu0 }
  0x89   :  { %v110_v31 = vadd.f32 %v109_v16, %v1554_v28  ;;  %v1626_v16 = vpop.permute.xlu2 %127 }
  0x8b   :  { %v121_v38 = vmax.f32 %v110_v31, 0.0 }
  0x8f   :  { %v212_v17 = vpop.f32.mrf.mxu2 }
  0x90   :  { %v112_v18 = vpop.f32.mrf.mxu0  ;;  %v213_v43 = vadd.f32 %v212_v17, %v1554_v28 }
  0x91   :  { %v113_v29 = vadd.f32 %v112_v18, %v1548_v21 }
  0x92   :  { %v224_v47 = vmax.f32 %v213_v43, 0.0 }
  0x93   :  { %v122_v34 = vmax.f32 %v113_v29, 0.0  ;;  %v1634_v29 = vpop.permute.xlu1 %174 }
  0x97   :  { %v215_v20 = vpop.f32.mrf.mxu2 }
  0x98   :  { %v115_v22 = vpop.f32.mrf.mxu0  ;;  %v216_v39 = vadd.f32 %v215_v20, %v1548_v21  ;;  %v1629_v20 = vpop.permute.xlu2 %132 }
  0x99   :  { %v116_v26 = vadd.f32 %v115_v22, %v1550_v24 }
  0x9a   :  { %v225_v46 = vmax.f32 %v216_v39, 0.0 }
  0x9b   :  { %v123_v32 = vmax.f32 %v116_v26, 0.0  ;;  %v1632_v26 = vpop.permute.xlu0 %169 }
  0x9f   :  { %v218_v23 = vpop.f32.mrf.mxu2 }
  0xa0   :  { %v118_v25 = vpop.f32.mrf.mxu0  ;;  %v219_v35 = vadd.f32 %v218_v23, %v1550_v24  ;;  %v189_v43 = vpop.permute.xlu2 %188 }
  0xa1   :  { %v119_v27 = vadd.f32 %v118_v25, %v1546_v19 }
  0xa2   :  { %v226_v44 = vmax.f32 %v219_v35, 0.0 }
  0xa3   :  { %v124_v30 = vmax.f32 %v119_v27, 0.0 }
  0xa5   :  { %154 = vmatpush.msra.mxu1 %v124_v30 }
  0xa7   :  { %v221_v33 = vpop.f32.mrf.mxu2  ;;  %155 = vmatpush.msra.mxu1 %v123_v32 }
  0xa8   :  { %v222_v36 = vadd.f32 %v221_v33, %v1546_v19  ;;  %v352_v37 = vpop.f32.mrf.mxu0 }
  0xa9   :  { %156 = vmatpush.msra.mxu1 %v122_v34  ;;  %v353_v58 = vadd.f32 %v352_v37, %v1554_v28 }
  0xaa   :  { %v227_v40 = vmax.f32 %v222_v36, 0.0 }
  0xab   :  { %157 = vmatpush.msra.mxu1 %v121_v38  ;;  %v364_v63 = vmax.f32 %v353_v58, 0.0 }
  0xac   :  { %240 = vmatpush.msra.mxu3 %v227_v40  ;;  %1267 = vmatmul.msk.f32.vlgmr.msra.gmra.mxu1 %vm135_vm1, %v1564_v41 }
  0xad   :  { %280 = vmatpush.msrb.mxu1 %v264_v42 }
  0xae   :  { %241 = vmatpush.msra.mxu3 %v226_v44 }
  0xaf   :  { %490 = vmatpush.msra.mxu1 %v474_v52 }
  0xb0   :  { %242 = vmatpush.msra.mxu3 %v225_v46  ;;  %v355_v48 = vpop.f32.mrf.mxu0 }
  0xb1   :  { %v356_v56 = vadd.f32 %v355_v48, %v1548_v21 }
  0xb2   :  { %243 = vmatpush.msra.mxu3 %v224_v47 }
  0xb3   :  { %1273 = vmatmul.msk.f32.vlgmr.msra.gmra.mxu3 %vm135_vm1, %v1564_v41  ;;  %v365_v60 = vmax.f32 %v356_v56, 0.0 }
  0xb4   :  { %1268 = vmatmul.msk.f32.gmra.mxu1 %vm135_vm1, %v1575_v49 }
  0xb8   :  { %v358_v51 = vpop.f32.mrf.mxu0 }
  0xb9   :  { %v359_v54 = vadd.f32 %v358_v51, %v1550_v24  ;;  %v1642_v51 = vperm.slane %v189_v43, 0 }
  0xbb   :  { %1274 = vmatmul.msk.f32.gmra.mxu3 %vm135_vm1, %v1575_v49  ;;  %v366_v59 = vmax.f32 %v359_v54, 0.0 }
  0xbc   :  { %1275 = vmatmul.msk.f32.vlgmr.msrb.gmra.mxu1 %vm79_vm0, %v1479_v4 }
  0xc0   :  { %v361_v53 = vpop.f32.mrf.mxu0 }
  0xc1   :  { %v362_v55 = vadd.f32 %v361_v53, %v1546_v19 }
  0xc3   :  { %v367_v57 = vmax.f32 %v362_v55, 0.0 }
  0xc4   :  { %1276 = vmatmul.msk.f32.gmra.mxu1 %vm79_vm0, %v1494_v8 }
  0xc5   :  { %380 = vmatpush.msrb.mxu2 %v367_v57 }
  0xc7   :  { %381 = vmatpush.msrb.mxu2 %v366_v59 }
  0xc8   :  { %v632_v62 = vpop.f32.mrf.mxu0 }
  0xc9   :  { %382 = vmatpush.msrb.mxu2 %v365_v60  ;;  %v633_v9 = vadd.f32 %v632_v62, %v1554_v28 }
  0xcb   :  { %383 = vmatpush.msrb.mxu2 %v364_v63  ;;  %v644_v13 = vmax.f32 %v633_v9, 0.0 }
  0xcc   :  { %1277 = vmatmul.msk.f32.gmra.mxu1 %vm79_vm0, %v1509_v11  ;;  %1285 = vmatmul.msk.f32.vlgmr.msrb.gmra.mxu2 %vm135_vm1, %v1564_v41 }
  0xd0   :  { %v635_v0 = vpop.f32.mrf.mxu0 }
  0xd1   :  { %v636_v6 = vadd.f32 %v635_v0, %v1548_v21 }
  0xd3   :  { %v645_v12 = vmax.f32 %v636_v6, 0.0 }
  0xd4   :  { %1278 = vmatmul.msk.f32.gmra.mxu1 %vm79_vm0, %v1524_v14  ;;  %1286 = vmatmul.msk.f32.gmra.mxu2 %vm135_vm1, %v1575_v49 }
  0xd8   :  { %v638_v1 = vpop.f32.mrf.mxu0 }
  0xd9   :  { %v639_v3 = vadd.f32 %v638_v1, %v1550_v24 }
  0xdb   :  { %v646_v10 = vmax.f32 %v639_v3, 0.0 }
  0xdc   :  { %1293 = vmatmul.msk.f32.vlgmr.msra.gmra.mxu1 %vm79_vm0, %v1479_v4 }
  0xe0   :  { %v641_v2 = vpop.f32.mrf.mxu0 }
  0xe1   :  { %v642_v5 = vadd.f32 %v641_v2, %v1546_v19 }
  0xe3   :  { %v647_v7 = vmax.f32 %v642_v5, 0.0 }
  0xe4   :  { %1294 = vmatmul.msk.f32.gmra.mxu1 %vm79_vm0, %v1494_v8 }
  0xe5   :  { %660 = vmatpush.msrb.mxu1 %v647_v7 }
  0xe7   :  { %661 = vmatpush.msrb.mxu1 %v646_v10 }
  0xe9   :  { %662 = vmatpush.msrb.mxu1 %v645_v12 }
  0xeb   :  { %663 = vmatpush.msrb.mxu1 %v644_v13 }
  0xec   :  { %1295 = vmatmul.msk.f32.gmra.mxu1 %vm79_vm0, %v1509_v11 }
  0xed   :  { %770 = vmatpush.msra.mxu1 %v754_v15 }
  0xf4   :  { %1296 = vmatmul.msk.f32.gmra.mxu1 %vm79_vm0, %v1524_v14 }
  0xfc   :  { %1309 = vmatmul.msk.f32.vlgmr.msrb.gmra.mxu1 %vm135_vm1, %v1564_v41 }
 0x104   :  { %1310 = vmatmul.msk.f32.gmra.mxu1 %vm135_vm1, %v1575_v49 }
 0x10c   :  { %1317 = vmatmul.msk.f32.vlgmr.msra.gmra.mxu1 %vm79_vm0, %v1479_v4 }
 0x114   :  { %1318 = vmatmul.msk.f32.gmra.mxu1 %vm79_vm0, %v1494_v8 }
 0x11c   :  { %1319 = vmatmul.msk.f32.gmra.mxu1 %vm79_vm0, %v1509_v11 }
 0x124   :  { %1320 = vmatmul.msk.f32.gmra.mxu1 %vm79_vm0, %v1524_v14 }
 0x129   :  { %v159_v17 = vpop.f32.mrf.mxu1 }
 0x12a   :  { %v160_v18 = vadd.f32 %v159_v17, %v1626_v16 }
 0x12c   :  { %v165_v23 = vmax.f32 %v160_v18, 0.0 }
 0x12e   :  { %v177_v31 = vmul.f32 %v1632_v26, %v165_v23  ;;  %v404_v23 = vld [vmem:[#allocation3 + $0x20] sm:$0xff] }
 0x131   :  { %v162_v22 = vpop.f32.mrf.mxu1 }
 0x132   :  { %v163_v25 = vadd.f32 %v162_v22, %v1629_v20 }
 0x134   :  { %v166_v27 = vmax.f32 %v163_v25, 0.0 }
 0x136   :  { %v245_v30 = vpop.f32.mrf.mxu3  ;;  %v178_v32 = vmul.f32 %v1634_v29, %v166_v27 }
 0x137   :  { %v246_v36 = vadd.f32 %v245_v30, %v1626_v16 }
 0x138   :  { %v179_v33 = vadd.f32 %v178_v32, %v177_v31 }
 0x139   :  { %v282_v34 = vpop.f32.mrf.mxu1  ;;  %v251_v40 = vmax.f32 %v246_v36, 0.0 }
 0x13a   :  { %v180_v35 = vrot.slane %v179_v33, 4  ;;  %v283_v7 = vadd.f32 %v282_v34, %v1554_v28 }
 0x13b   :  { %v253_v48 = vmul.f32 %v251_v40, %v1632_v26 }
 0x13c   :  { %v181_v37 = vadd.f32 %v180_v35, %v179_v33  ;;  %v294_v18 = vmax.f32 %v283_v7, 0.0 }
 0x13e   :  { %v248_v38 = vpop.f32.mrf.mxu3  ;;  %v182_v39 = vrot.slane %v181_v37, 2 }
 0x13f   :  { %v249_v42 = vadd.f32 %v248_v38, %v1629_v20 }
 0x140   :  { %v183_v44 = vadd.f32 %v182_v39, %v181_v37 }
 0x141   :  { %v252_v45 = vmax.f32 %v249_v42, 0.0  ;;  %v285_v46 = vpop.f32.mrf.mxu1 }
 0x142   :  { %v184_v47 = vrot.slane %v183_v44, 1  ;;  %v286_v3 = vadd.f32 %v285_v46, %v1548_v21 }
 0x143   :  { %v254_v50 = vmul.f32 %v252_v45, %v1634_v29 }
 0x144   :  { %v185_v52 = vadd.f32 %v184_v47, %v183_v44  ;;  %v295_v12 = vmax.f32 %v286_v3, 0.0 }
 0x145   :  { %v255_v53 = vadd.f32 %v254_v50, %v253_v48 }
 0x146   :  { %v192_v55 = vadd.f32 %v1642_v51, %v185_v52 }
 0x147   :  { %v256_v54 = vrot.slane %v255_v53, 4 }
 0x148   :  { %193 = vst [vmem:[#allocation6] sm:$0x1] %v192_v55 }
 0x149   :  { %v257_v56 = vadd.f32 %v256_v54, %v255_v53  ;;  %v288_v57 = vpop.f32.mrf.mxu1 }
 0x14a   :  { %v289_v0 = vadd.f32 %v288_v57, %v1550_v24 }
 0x14b   :  { %v258_v58 = vrot.slane %v257_v56, 2 }
 0x14c   :  { %v296_v9 = vmax.f32 %v289_v0, 0.0 }
 0x14d   :  { %v259_v59 = vadd.f32 %v258_v58, %v257_v56 }
 0x14f   :  { %v260_v60 = vrot.slane %v259_v59, 1  ;;  %v385_v61 = vpop.f32.mrf.mxu2 }
 0x150   :  { %v386_v5 = vadd.f32 %v385_v61, %v1626_v16 }
 0x151   :  { %v261_v62 = vadd.f32 %v260_v60, %v259_v59  ;;  %v291_v63 = vpop.f32.mrf.mxu1 }
 0x152   :  { %v292_v1 = vadd.f32 %v291_v63, %v1546_v19  ;;  %v391_v13 = vmax.f32 %v386_v5, 0.0 }
 0x153   :  { %v262_v2 = vadd.f32 %v261_v62, %v1642_v51 }
 0x154   :  { %v297_v6 = vmax.f32 %v292_v1, 0.0  ;;  %v393_v25 = vmul.f32 %v391_v13, %v1632_v26 }
 0x155   :  { %263 = vst [vmem:[#allocation6 + $0x1] sm:$0x1] %v262_v2 }
 0x156   :  { %310 = vmatpush.msrb.mxu3 %v297_v6 }
 0x157   :  { %v388_v10 = vpop.f32.mrf.mxu2 }
 0x158   :  { %v389_v15 = vadd.f32 %v388_v10, %v1629_v20  ;;  %311 = vmatpush.msrb.mxu3 %v296_v9 }
 0x159   :  { %v492_v17 = vpop.f32.mrf.mxu1 }
 0x15a   :  { %v392_v22 = vmax.f32 %v389_v15, 0.0  ;;  %312 = vmatpush.msrb.mxu3 %v295_v12  ;;  %v493_v46 = vadd.f32 %v492_v17, %v1554_v28 }
 0x15c   :  { %v394_v27 = vmul.f32 %v392_v22, %v1634_v29  ;;  %313 = vmatpush.msrb.mxu3 %v294_v18  ;;  %v504_v52 = vmax.f32 %v493_v46, 0.0 }
 0x15d   :  { %1279 = vmatmul.msk.f32.vlgmr.msrb.gmra.mxu3 %vm135_vm1, %v1564_v41 }
 0x15e   :  { %v395_v30 = vadd.f32 %v394_v27, %v393_v25  ;;  %420 = vmatpush.msra.mxu3 %v404_v23  ;;  %v894_v25 = vld [vmem:[#allocation3 + $0x58] sm:$0xff] }
 0x160   :  { %v396_v31 = vrot.slane %v395_v30, 4 }
 0x161   :  { %v495_v32 = vpop.f32.mrf.mxu1 }
 0x162   :  { %v397_v33 = vadd.f32 %v396_v31, %v395_v30  ;;  %v496_v44 = vadd.f32 %v495_v32, %v1548_v21 }
 0x164   :  { %v398_v34 = vrot.slane %v397_v33, 2  ;;  %v505_v48 = vmax.f32 %v496_v44, 0.0 }
 0x165   :  { %1280 = vmatmul.msk.f32.gmra.mxu3 %vm135_vm1, %v1575_v49 }
 0x166   :  { %v399_v35 = vadd.f32 %v398_v34, %v397_v33 }
 0x168   :  { %v400_v36 = vrot.slane %v399_v35, 1 }
 0x169   :  { %v498_v37 = vpop.f32.mrf.mxu1 }
 0x16a   :  { %v401_v38 = vadd.f32 %v400_v36, %v399_v35  ;;  %v499_v42 = vadd.f32 %v498_v37, %v1550_v24 }
 0x16c   :  { %v402_v39 = vadd.f32 %v401_v38, %v1642_v51  ;;  %v506_v47 = vmax.f32 %v499_v42, 0.0 }
 0x16d   :  { %1287 = vmatmul.msk.f32.vlgmr.msra.gmra.mxu3 %vm79_vm0, %v1479_v4 }
 0x16e   :  { %403 = vst [vmem:[#allocation6 + $0x3] sm:$0x1] %v402_v39 }
 0x171   :  { %v501_v40 = vpop.f32.mrf.mxu1 }
 0x172   :  { %v502_v43 = vadd.f32 %v501_v40, %v1546_v19 }
 0x174   :  { %v507_v45 = vmax.f32 %v502_v43, 0.0 }
 0x175   :  { %1288 = vmatmul.msk.f32.gmra.mxu3 %vm79_vm0, %v1494_v8 }
 0x176   :  { %520 = vmatpush.msrb.mxu3 %v507_v45 }
 0x178   :  { %521 = vmatpush.msrb.mxu3 %v506_v47 }
 0x179   :  { %v665_v50 = vpop.f32.mrf.mxu1 }
 0x17a   :  { %522 = vmatpush.msrb.mxu3 %v505_v48  ;;  %v666_v53 = vadd.f32 %v665_v50, %v1626_v16 }
 0x17c   :  { %523 = vmatpush.msrb.mxu3 %v504_v52  ;;  %v671_v55 = vmax.f32 %v666_v53, 0.0 }
 0x17d   :  { %1289 = vmatmul.msk.f32.gmra.mxu3 %vm79_vm0, %v1509_v11 }
 0x17e   :  { %v673_v58 = vmul.f32 %v671_v55, %v1632_v26 }
 0x181   :  { %v668_v54 = vpop.f32.mrf.mxu1 }
 0x182   :  { %v669_v56 = vadd.f32 %v668_v54, %v1629_v20 }
 0x184   :  { %v672_v57 = vmax.f32 %v669_v56, 0.0 }
 0x185   :  { %1290 = vmatmul.msk.f32.gmra.mxu3 %vm79_vm0, %v1524_v14 }
 0x186   :  { %v674_v59 = vmul.f32 %v672_v57, %v1634_v29 }
 0x188   :  { %v675_v60 = vadd.f32 %v674_v59, %v673_v58 }
 0x189   :  { %v772_v61 = vpop.f32.mrf.mxu1 }
 0x18a   :  { %v676_v62 = vrot.slane %v675_v60, 4  ;;  %v773_v17 = vadd.f32 %v772_v61, %v1554_v28  ;;  %v544_v61 = vld [vmem:[#allocation3 + $0x30] sm:$0xff] }
 0x18c   :  { %v677_v63 = vadd.f32 %v676_v62, %v675_v60  ;;  %v784_v23 = vmax.f32 %v773_v17, 0.0 }
 0x18d   :  { %1297 = vmatmul.msk.f32.vlgmr.msrb.gmra.mxu3 %vm135_vm1, %v1564_v41 }
 0x18e   :  { %v678_v0 = vrot.slane %v677_v63, 2 }
 0x190   :  { %v679_v1 = vadd.f32 %v678_v0, %v677_v63 }
 0x191   :  { %v775_v2 = vpop.f32.mrf.mxu1 }
 0x192   :  { %v680_v3 = vrot.slane %v679_v1, 1  ;;  %v776_v13 = vadd.f32 %v775_v2, %v1548_v21 }
 0x194   :  { %v681_v5 = vadd.f32 %v680_v3, %v679_v1  ;;  %v785_v22 = vmax.f32 %v776_v13, 0.0 }
 0x195   :  { %1298 = vmatmul.msk.f32.gmra.mxu3 %vm135_vm1, %v1575_v49 }
 0x196   :  { %v682_v6 = vadd.f32 %v681_v5, %v1642_v51 }
 0x198   :  { %683 = vst [vmem:[#allocation6 + $0x7] sm:$0x1] %v682_v6 }
 0x199   :  { %v778_v7 = vpop.f32.mrf.mxu1 }
 0x19a   :  { %v779_v10 = vadd.f32 %v778_v7, %v1550_v24 }
 0x19c   :  { %v786_v18 = vmax.f32 %v779_v10, 0.0 }
 0x1a1   :  { %v781_v9 = vpop.f32.mrf.mxu1 }
 0x1a2   :  { %v782_v12 = vadd.f32 %v781_v9, %v1546_v19 }
 0x1a4   :  { %v787_v15 = vmax.f32 %v782_v12, 0.0 }
 0x1a6   :  { %800 = vmatpush.msrb.mxu0 %v787_v15 }
 0x1a8   :  { %801 = vmatpush.msrb.mxu0 %v786_v18 }
 0x1aa   :  { %802 = vmatpush.msrb.mxu0 %v785_v22 }
 0x1ac   :  { %803 = vmatpush.msrb.mxu0 %v784_v23 }
 0x1ad   :  { %1321 = vmatmul.msk.f32.vlgmr.msrb.gmra.mxu0 %vm135_vm1, %v1564_v41 }
 0x1ae   :  { %910 = vmatpush.msra.mxu0 %v894_v25 }
 0x1b5   :  { %1322 = vmatmul.msk.f32.gmra.mxu0 %vm135_vm1, %v1575_v49 }
 0x1bd   :  { %1329 = vmatmul.msk.f32.vlgmr.msra.gmra.mxu0 %vm79_vm0, %v1479_v4 }
 0x1c5   :  { %1330 = vmatmul.msk.f32.gmra.mxu0 %vm79_vm0, %v1494_v8 }
 0x1cd   :  { %1331 = vmatmul.msk.f32.gmra.mxu0 %vm79_vm0, %v1509_v11 }
 0x1d5   :  { %1332 = vmatmul.msk.f32.gmra.mxu0 %vm79_vm0, %v1524_v14 }
 0x1e0   :  { %v315_v27 = vpop.f32.mrf.mxu3 }
 0x1e1   :  { %v316_v30 = vadd.f32 %v315_v27, %v1626_v16 }
 0x1e3   :  { %v321_v32 = vmax.f32 %v316_v30, 0.0 }
 0x1e5   :  { %v323_v35 = vmul.f32 %v321_v32, %v1632_v26 }
 0x1e8   :  { %v318_v31 = vpop.f32.mrf.mxu3 }
 0x1e9   :  { %v319_v33 = vadd.f32 %v318_v31, %v1629_v20 }
 0x1eb   :  { %v322_v34 = vmax.f32 %v319_v33, 0.0 }
 0x1ed   :  { %v324_v36 = vmul.f32 %v322_v34, %v1634_v29 }
 0x1ef   :  { %v325_v37 = vadd.f32 %v324_v36, %v323_v35 }
 0x1f0   :  { %v422_v38 = vpop.f32.mrf.mxu3 }
 0x1f1   :  { %v326_v39 = vrot.slane %v325_v37, 4  ;;  %v423_v56 = vadd.f32 %v422_v38, %v1554_v28 }
 0x1f3   :  { %v327_v40 = vadd.f32 %v326_v39, %v325_v37  ;;  %v434_v60 = vmax.f32 %v423_v56, 0.0  ;;  %v1034_v56 = vld [vmem:[#allocation3 + $0x68] sm:$0xff] }
 0x1f5   :  { %v328_v42 = vrot.slane %v327_v40, 2 }
 0x1f7   :  { %v329_v43 = vadd.f32 %v328_v42, %v327_v40 }
 0x1f8   :  { %v425_v44 = vpop.f32.mrf.mxu3 }
 0x1f9   :  { %v330_v45 = vrot.slane %v329_v43, 1  ;;  %v426_v54 = vadd.f32 %v425_v44, %v1548_v21 }
 0x1fb   :  { %v331_v46 = vadd.f32 %v330_v45, %v329_v43  ;;  %v435_v58 = vmax.f32 %v426_v54, 0.0 }
 0x1fd   :  { %v332_v47 = vadd.f32 %v331_v46, %v1642_v51 }
 0x1ff   :  { %333 = vst [vmem:[#allocation6 + $0x2] sm:$0x1] %v332_v47 }
 0x200   :  { %v428_v48 = vpop.f32.mrf.mxu3 }
 0x201   :  { %v429_v52 = vadd.f32 %v428_v48, %v1550_v24 }
 0x203   :  { %v436_v57 = vmax.f32 %v429_v52, 0.0 }
 0x208   :  { %v431_v50 = vpop.f32.mrf.mxu3 }
 0x209   :  { %v432_v53 = vadd.f32 %v431_v50, %v1546_v19 }
 0x20b   :  { %v437_v55 = vmax.f32 %v432_v53, 0.0 }
 0x20d   :  { %450 = vmatpush.msra.mxu2 %v437_v55 }
 0x20f   :  { %451 = vmatpush.msra.mxu2 %v436_v57 }
 0x210   :  { %v525_v59 = vpop.f32.mrf.mxu3 }
 0x211   :  { %452 = vmatpush.msra.mxu2 %v435_v58  ;;  %v526_v62 = vadd.f32 %v525_v59, %v1626_v16 }
 0x213   :  { %453 = vmatpush.msra.mxu2 %v434_v60  ;;  %v531_v0 = vmax.f32 %v526_v62, 0.0 }
 0x214   :  { %1291 = vmatmul.msk.f32.vlgmr.msra.gmra.mxu2 %vm135_vm1, %v1564_v41 }
 0x215   :  { %560 = vmatpush.msrb.mxu2 %v544_v61  ;;  %v533_v3 = vmul.f32 %v531_v0, %v1632_v26 }
 0x218   :  { %v528_v63 = vpop.f32.mrf.mxu3 }
 0x219   :  { %v529_v1 = vadd.f32 %v528_v63, %v1629_v20 }
 0x21b   :  { %v532_v2 = vmax.f32 %v529_v1, 0.0 }
 0x21c   :  { %1292 = vmatmul.msk.f32.gmra.mxu2 %vm135_vm1, %v1575_v49 }
 0x21d   :  { %v534_v5 = vmul.f32 %v532_v2, %v1634_v29 }
 0x21f   :  { %v535_v6 = vadd.f32 %v534_v5, %v533_v3 }
 0x221   :  { %v536_v7 = vrot.slane %v535_v6, 4 }
 0x223   :  { %v537_v9 = vadd.f32 %v536_v7, %v535_v6 }
 0x224   :  { %1299 = vmatmul.msk.f32.vlgmr.msrb.gmra.mxu2 %vm79_vm0, %v1479_v4 }
 0x225   :  { %v538_v10 = vrot.slane %v537_v9, 2 }
 0x227   :  { %v539_v12 = vadd.f32 %v538_v10, %v537_v9 }
 0x229   :  { %v540_v13 = vrot.slane %v539_v12, 1 }
 0x22a   :  { %v805_v15 = vpop.f32.mrf.mxu0 }
 0x22b   :  { %v541_v17 = vadd.f32 %v540_v13, %v539_v12  ;;  %v806_v22 = vadd.f32 %v805_v15, %v1626_v16 }
 0x22c   :  { %1300 = vmatmul.msk.f32.gmra.mxu2 %vm79_vm0, %v1494_v8 }
 0x22d   :  { %v542_v18 = vadd.f32 %v541_v17, %v1642_v51  ;;  %v811_v25 = vmax.f32 %v806_v22, 0.0 }
 0x22f   :  { %543 = vst [vmem:[#allocation6 + $0x5] sm:$0x1] %v542_v18  ;;  %v813_v31 = vmul.f32 %v811_v25, %v1632_v26 }
 0x232   :  { %v808_v23 = vpop.f32.mrf.mxu0 }
 0x233   :  { %v809_v27 = vadd.f32 %v808_v23, %v1629_v20 }
 0x234   :  { %1301 = vmatmul.msk.f32.gmra.mxu2 %vm79_vm0, %v1509_v11 }
 0x235   :  { %v812_v30 = vmax.f32 %v809_v27, 0.0 }
 0x237   :  { %v814_v32 = vmul.f32 %v812_v30, %v1634_v29 }
 0x239   :  { %v815_v33 = vadd.f32 %v814_v32, %v813_v31 }
 0x23a   :  { %v912_v34 = vpop.f32.mrf.mxu0 }
 0x23b   :  { %v816_v35 = vrot.slane %v815_v33, 4  ;;  %v913_v52 = vadd.f32 %v912_v34, %v1554_v28 }
 0x23c   :  { %1302 = vmatmul.msk.f32.gmra.mxu2 %vm79_vm0, %v1524_v14 }
 0x23d   :  { %v817_v36 = vadd.f32 %v816_v35, %v815_v33  ;;  %v924_v55 = vmax.f32 %v913_v52, 0.0  ;;  %v684_v33 = vld [vmem:[#allocation3 + $0x40] sm:$0xff] }
 0x23f   :  { %v818_v37 = vrot.slane %v817_v36, 2 }
 0x241   :  { %v819_v38 = vadd.f32 %v818_v37, %v817_v36 }
 0x242   :  { %v915_v39 = vpop.f32.mrf.mxu0 }
 0x243   :  { %v820_v40 = vrot.slane %v819_v38, 1  ;;  %v916_v48 = vadd.f32 %v915_v39, %v1548_v21 }
 0x245   :  { %v821_v42 = vadd.f32 %v820_v40, %v819_v38  ;;  %v925_v54 = vmax.f32 %v916_v48, 0.0 }
 0x247   :  { %v822_v43 = vadd.f32 %v821_v42, %v1642_v51 }
 0x249   :  { %823 = vst [vmem:[#allocation6 + $0x9] sm:$0x1] %v822_v43 }
 0x24a   :  { %v918_v44 = vpop.f32.mrf.mxu0 }
 0x24b   :  { %v919_v46 = vadd.f32 %v918_v44, %v1550_v24 }
 0x24d   :  { %v926_v53 = vmax.f32 %v919_v46, 0.0 }
 0x252   :  { %v921_v45 = vpop.f32.mrf.mxu0 }
 0x253   :  { %v922_v47 = vadd.f32 %v921_v45, %v1546_v19 }
 0x255   :  { %v927_v50 = vmax.f32 %v922_v47, 0.0 }
 0x257   :  { %940 = vmatpush.msrb.mxu1 %v927_v50 }
 0x259   :  { %941 = vmatpush.msrb.mxu1 %v926_v53 }
 0x25b   :  { %942 = vmatpush.msrb.mxu1 %v925_v54 }
 0x25d   :  { %943 = vmatpush.msrb.mxu1 %v924_v55 }
 0x25e   :  { %1333 = vmatmul.msk.f32.vlgmr.msrb.gmra.mxu1 %vm135_vm1, %v1564_v41 }
 0x25f   :  { %1050 = vmatpush.msra.mxu1 %v1034_v56 }
 0x266   :  { %1334 = vmatmul.msk.f32.gmra.mxu1 %vm135_vm1, %v1575_v49 }
 0x26e   :  { %1341 = vmatmul.msk.f32.vlgmr.msra.gmra.mxu1 %vm79_vm0, %v1479_v4 }
 0x276   :  { %1342 = vmatmul.msk.f32.gmra.mxu1 %vm79_vm0, %v1494_v8 }
 0x27e   :  { %1343 = vmatmul.msk.f32.gmra.mxu1 %vm79_vm0, %v1509_v11 }
 0x286   :  { %1344 = vmatmul.msk.f32.gmra.mxu1 %vm79_vm0, %v1524_v14 }
 0x297   :  { %v455_v57 = vpop.f32.mrf.mxu2 }
 0x298   :  { %v456_v58 = vadd.f32 %v455_v57, %v1626_v16 }
 0x29a   :  { %v461_v60 = vmax.f32 %v456_v58, 0.0 }
 0x29c   :  { %v463_v63 = vmul.f32 %v461_v60, %v1632_v26 }
 0x29f   :  { %v458_v59 = vpop.f32.mrf.mxu2 }
 0x2a0   :  { %v459_v61 = vadd.f32 %v458_v59, %v1629_v20 }
 0x2a2   :  { %v462_v62 = vmax.f32 %v459_v61, 0.0 }
 0x2a4   :  { %v464_v0 = vmul.f32 %v462_v62, %v1634_v29 }
 0x2a6   :  { %v465_v1 = vadd.f32 %v464_v0, %v463_v63 }
 0x2a7   :  { %v562_v2 = vpop.f32.mrf.mxu2 }
 0x2a8   :  { %v466_v3 = vrot.slane %v465_v1, 4  ;;  %v563_v27 = vadd.f32 %v562_v2, %v1554_v28 }
 0x2aa   :  { %v467_v5 = vadd.f32 %v466_v3, %v465_v1  ;;  %v574_v32 = vmax.f32 %v563_v27, 0.0  ;;  %v1174_v1 = vld [vmem:[#allocation3 + $0x78] sm:$0xff] }
 0x2ac   :  { %v468_v6 = vrot.slane %v467_v5, 2 }
 0x2ae   :  { %v469_v7 = vadd.f32 %v468_v6, %v467_v5 }
 0x2af   :  { %v565_v9 = vpop.f32.mrf.mxu2 }
 0x2b0   :  { %v470_v10 = vrot.slane %v469_v7, 1  ;;  %v566_v23 = vadd.f32 %v565_v9, %v1548_v21 }
 0x2b2   :  { %v471_v12 = vadd.f32 %v470_v10, %v469_v7  ;;  %v575_v31 = vmax.f32 %v566_v23, 0.0 }
 0x2b4   :  { %v472_v13 = vadd.f32 %v471_v12, %v1642_v51 }
 0x2b6   :  { %473 = vst [vmem:[#allocation6 + $0x4] sm:$0x1] %v472_v13 }
 0x2b7   :  { %v568_v15 = vpop.f32.mrf.mxu2 }
 0x2b8   :  { %v569_v18 = vadd.f32 %v568_v15, %v1550_v24 }
 0x2ba   :  { %v576_v30 = vmax.f32 %v569_v18, 0.0 }
 0x2bf   :  { %v571_v17 = vpop.f32.mrf.mxu2 }
 0x2c0   :  { %v572_v22 = vadd.f32 %v571_v17, %v1546_v19 }
 0x2c2   :  { %v577_v25 = vmax.f32 %v572_v22, 0.0 }
 0x2c4   :  { %590 = vmatpush.msra.mxu3 %v577_v25 }
 0x2c6   :  { %591 = vmatpush.msra.mxu3 %v576_v30 }
 0x2c8   :  { %592 = vmatpush.msra.mxu3 %v575_v31 }
 0x2ca   :  { %593 = vmatpush.msra.mxu3 %v574_v32 }
 0x2cb   :  { %1303 = vmatmul.msk.f32.vlgmr.msra.gmra.mxu3 %vm135_vm1, %v1564_v41 }
 0x2cc   :  { %700 = vmatpush.msrb.mxu3 %v684_v33 }
 0x2d3   :  { %1304 = vmatmul.msk.f32.gmra.mxu3 %vm135_vm1, %v1575_v49 }
 0x2db   :  { %1311 = vmatmul.msk.f32.vlgmr.msrb.gmra.mxu3 %vm79_vm0, %v1479_v4  ;;  %v945_v34 = vpop.f32.mrf.mxu1 }
 0x2dc   :  { %v946_v35 = vadd.f32 %v945_v34, %v1626_v16 }
 0x2de   :  { %v951_v37 = vmax.f32 %v946_v35, 0.0 }
 0x2e0   :  { %v953_v40 = vmul.f32 %v951_v37, %v1632_v26 }
 0x2e3   :  { %1312 = vmatmul.msk.f32.gmra.mxu3 %vm79_vm0, %v1494_v8  ;;  %v948_v36 = vpop.f32.mrf.mxu1 }
 0x2e4   :  { %v949_v38 = vadd.f32 %v948_v36, %v1629_v20 }
 0x2e6   :  { %v952_v39 = vmax.f32 %v949_v38, 0.0 }
 0x2e8   :  { %v954_v42 = vmul.f32 %v952_v39, %v1634_v29 }
 0x2ea   :  { %v955_v43 = vadd.f32 %v954_v42, %v953_v40 }
 0x2eb   :  { %1313 = vmatmul.msk.f32.gmra.mxu3 %vm79_vm0, %v1509_v11  ;;  %v1052_v44 = vpop.f32.mrf.mxu1 }
 0x2ec   :  { %v956_v45 = vrot.slane %v955_v43, 4  ;;  %v1053_v61 = vadd.f32 %v1052_v44, %v1554_v28 }
 0x2ee   :  { %v957_v46 = vadd.f32 %v956_v45, %v955_v43  ;;  %v1064_v0 = vmax.f32 %v1053_v61, 0.0  ;;  %v824_v43 = vld [vmem:[#allocation3 + $0x50] sm:$0xff] }
 0x2f0   :  { %v958_v47 = vrot.slane %v957_v46, 2 }
 0x2f2   :  { %v959_v48 = vadd.f32 %v958_v47, %v957_v46 }
 0x2f3   :  { %1314 = vmatmul.msk.f32.gmra.mxu3 %vm79_vm0, %v1524_v14  ;;  %v1055_v50 = vpop.f32.mrf.mxu1 }
 0x2f4   :  { %v960_v52 = vrot.slane %v959_v48, 1  ;;  %v1056_v59 = vadd.f32 %v1055_v50, %v1548_v21 }
 0x2f6   :  { %v961_v53 = vadd.f32 %v960_v52, %v959_v48  ;;  %v1065_v63 = vmax.f32 %v1056_v59, 0.0 }
 0x2f8   :  { %v962_v54 = vadd.f32 %v961_v53, %v1642_v51 }
 0x2fa   :  { %963 = vst [vmem:[#allocation6 + $0xb] sm:$0x1] %v962_v54 }
 0x2fb   :  { %v1058_v55 = vpop.f32.mrf.mxu1 }
 0x2fc   :  { %v1059_v57 = vadd.f32 %v1058_v55, %v1550_v24 }
 0x2fe   :  { %v1066_v62 = vmax.f32 %v1059_v57, 0.0 }
 0x303   :  { %v1061_v56 = vpop.f32.mrf.mxu1 }
 0x304   :  { %v1062_v58 = vadd.f32 %v1061_v56, %v1546_v19 }
 0x306   :  { %v1067_v60 = vmax.f32 %v1062_v58, 0.0 }
 0x308   :  { %1080 = vmatpush.msrb.mxu0 %v1067_v60 }
 0x30a   :  { %1081 = vmatpush.msrb.mxu0 %v1066_v62 }
 0x30c   :  { %1082 = vmatpush.msrb.mxu0 %v1065_v63 }
 0x30e   :  { %1083 = vmatpush.msrb.mxu0 %v1064_v0 }
 0x30f   :  { %1345 = vmatmul.msk.f32.vlgmr.msrb.gmra.mxu0 %vm135_vm1, %v1564_v41 }
 0x310   :  { %1190 = vmatpush.msra.mxu0 %v1174_v1 }
 0x317   :  { %1346 = vmatmul.msk.f32.gmra.mxu0 %vm135_vm1, %v1575_v49 }
 0x31f   :  { %1353 = vmatmul.msk.f32.vlgmr.msra.gmra.mxu0 %vm79_vm0, %v1479_v4 }
 0x327   :  { %1354 = vmatmul.msk.f32.gmra.mxu0 %vm79_vm0, %v1494_v8 }
 0x32f   :  { %1355 = vmatmul.msk.f32.gmra.mxu0 %vm79_vm0, %v1509_v11 }
 0x337   :  { %1356 = vmatmul.msk.f32.gmra.mxu0 %vm79_vm0, %v1524_v14 }
 0x34e   :  { %v595_v2 = vpop.f32.mrf.mxu3 }
 0x34f   :  { %v596_v3 = vadd.f32 %v595_v2, %v1626_v16 }
 0x351   :  { %v601_v6 = vmax.f32 %v596_v3, 0.0 }
 0x353   :  { %v603_v10 = vmul.f32 %v601_v6, %v1632_v26 }
 0x356   :  { %v598_v5 = vpop.f32.mrf.mxu3 }
 0x357   :  { %v599_v7 = vadd.f32 %v598_v5, %v1629_v20 }
 0x359   :  { %v602_v9 = vmax.f32 %v599_v7, 0.0 }
 0x35b   :  { %v604_v12 = vmul.f32 %v602_v9, %v1634_v29 }
 0x35d   :  { %v605_v13 = vadd.f32 %v604_v12, %v603_v10 }
 0x35e   :  { %v702_v15 = vpop.f32.mrf.mxu3 }
 0x35f   :  { %v606_v17 = vrot.slane %v605_v13, 4  ;;  %v703_v38 = vadd.f32 %v702_v15, %v1554_v28 }
 0x361   :  { %v607_v18 = vadd.f32 %v606_v17, %v605_v13  ;;  %v714_v42 = vmax.f32 %v703_v38, 0.0 }
 0x363   :  { %v608_v22 = vrot.slane %v607_v18, 2 }
 0x365   :  { %v609_v23 = vadd.f32 %v608_v22, %v607_v18 }
 0x366   :  { %v705_v25 = vpop.f32.mrf.mxu3 }
 0x367   :  { %v610_v27 = vrot.slane %v609_v23, 1  ;;  %v706_v36 = vadd.f32 %v705_v25, %v1548_v21 }
 0x369   :  { %v611_v30 = vadd.f32 %v610_v27, %v609_v23  ;;  %v715_v40 = vmax.f32 %v706_v36, 0.0 }
 0x36b   :  { %v612_v31 = vadd.f32 %v611_v30, %v1642_v51 }
 0x36d   :  { %613 = vst [vmem:[#allocation6 + $0x6] sm:$0x1] %v612_v31 }
 0x36e   :  { %v708_v32 = vpop.f32.mrf.mxu3 }
 0x36f   :  { %v709_v34 = vadd.f32 %v708_v32, %v1550_v24 }
 0x371   :  { %v716_v39 = vmax.f32 %v709_v34, 0.0 }
 0x376   :  { %v711_v33 = vpop.f32.mrf.mxu3 }
 0x377   :  { %v712_v35 = vadd.f32 %v711_v33, %v1546_v19 }
 0x379   :  { %v717_v37 = vmax.f32 %v712_v35, 0.0 }
 0x37b   :  { %730 = vmatpush.msra.mxu2 %v717_v37 }
 0x37d   :  { %731 = vmatpush.msra.mxu2 %v716_v39 }
 0x37f   :  { %732 = vmatpush.msra.mxu2 %v715_v40 }
 0x381   :  { %733 = vmatpush.msra.mxu2 %v714_v42 }
 0x382   :  { %1315 = vmatmul.msk.f32.vlgmr.msra.gmra.mxu2 %vm135_vm1, %v1564_v41 }
 0x383   :  { %840 = vmatpush.msrb.mxu2 %v824_v43 }
 0x38a   :  { %1316 = vmatmul.msk.f32.gmra.mxu2 %vm135_vm1, %v1575_v49 }
 0x38c   :  { %v1085_v44 = vpop.f32.mrf.mxu0 }
 0x38d   :  { %v1086_v45 = vadd.f32 %v1085_v44, %v1626_v16 }
 0x38f   :  { %v1091_v47 = vmax.f32 %v1086_v45, 0.0 }
 0x391   :  { %v1093_v52 = vmul.f32 %v1091_v47, %v1632_v26  ;;  %v964_v47 = vld [vmem:[#allocation3 + $0x60] sm:$0xff] }
 0x392   :  { %1323 = vmatmul.msk.f32.vlgmr.msrb.gmra.mxu2 %vm79_vm0, %v1479_v4 }
 0x394   :  { %v1088_v46 = vpop.f32.mrf.mxu0 }
 0x395   :  { %v1089_v48 = vadd.f32 %v1088_v46, %v1629_v20 }
 0x397   :  { %v1092_v50 = vmax.f32 %v1089_v48, 0.0 }
 0x399   :  { %v1094_v53 = vmul.f32 %v1092_v50, %v1634_v29 }
 0x39a   :  { %1324 = vmatmul.msk.f32.gmra.mxu2 %vm79_vm0, %v1494_v8 }
 0x39b   :  { %v1095_v54 = vadd.f32 %v1094_v53, %v1093_v52 }
 0x39c   :  { %v1192_v55 = vpop.f32.mrf.mxu0 }
 0x39d   :  { %v1096_v56 = vrot.slane %v1095_v54, 4 }
 0x39f   :  { %v1097_v57 = vadd.f32 %v1096_v56, %v1095_v54  ;;  %v1367_v56 = vld [vmem:[%s1894_s1] sm:$0xff] }
 0x3a1   :  { %v1098_v58 = vrot.slane %v1097_v57, 2 }
 0x3a2   :  { %1325 = vmatmul.msk.f32.gmra.mxu2 %vm79_vm0, %v1509_v11  ;;  %v1193_v11 = vadd.f32 %v1192_v55, %v1554_v28 }
 0x3a3   :  { %v1099_v4 = vadd.f32 %v1098_v58, %v1097_v57 }
 0x3a4   :  { %v1195_v59 = vpop.f32.mrf.mxu0  ;;  %v1204_v7 = vmax.f32 %v1193_v11, 0.0 }
 0x3a5   :  { %v1100_v60 = vrot.slane %v1099_v4, 1  ;;  %v1196_v2 = vadd.f32 %v1195_v59, %v1548_v21  ;;  %v1368_v59 = vld [vmem:[%s1894_s1 + $0x8] sm:$0xff] }
 0x3a7   :  { %v1101_v61 = vadd.f32 %v1100_v60, %v1099_v4  ;;  %v1205_v6 = vmax.f32 %v1196_v2, 0.0 }
 0x3a9   :  { %v1102_v62 = vadd.f32 %v1101_v61, %v1642_v51 }
 0x3aa   :  { %1326 = vmatmul.msk.f32.gmra.mxu2 %vm79_vm0, %v1524_v14 }
 0x3ab   :  { %1103 = vst [vmem:[#allocation6 + $0xd] sm:$0x1] %v1102_v62 }
 0x3ac   :  { %v1198_v63 = vpop.f32.mrf.mxu0 }
 0x3ad   :  { %v1199_v0 = vadd.f32 %v1198_v63, %v1550_v24 }
 0x3af   :  { %v1206_v5 = vmax.f32 %v1199_v0, 0.0 }
 0x3b4   :  { %v1201_v8 = vpop.f32.mrf.mxu0 }
 0x3b5   :  { %v1202_v1 = vadd.f32 %v1201_v8, %v1546_v19  ;;  %v1369_v8 = vld [vmem:[%s1894_s1 + $0x10] sm:$0xff] }
 0x3b7   :  { %v1207_v3 = vmax.f32 %v1202_v1, 0.0  ;;  %v1370_v1 = vld [vmem:[%s1894_s1 + $0x18] sm:$0xff] }
 0x3b9   :  { %1220 = vmatpush.msrb.mxu1 %v1207_v3 }
 0x3bb   :  { %1221 = vmatpush.msrb.mxu1 %v1206_v5 }
 0x3bd   :  { %1222 = vmatpush.msrb.mxu1 %v1205_v6 }
 0x3bf   :  { %1223 = vmatpush.msrb.mxu1 %v1204_v7 }
 0x3c0   :  { %1357 = vmatmul.msk.f32.vlgmr.msrb.gmra.mxu1 %vm135_vm1, %v1564_v41 }
 0x3c8   :  { %1358 = vmatmul.msk.f32.gmra.mxu1 %vm135_vm1, %v1575_v49 }
 0x405   :  { %v735_v14 = vpop.f32.mrf.mxu2 }
 0x406   :  { %v736_v9 = vadd.f32 %v735_v14, %v1626_v16 }
 0x408   :  { %v741_v12 = vmax.f32 %v736_v9, 0.0 }
 0x40a   :  { %v743_v17 = vmul.f32 %v741_v12, %v1632_v26 }
 0x40d   :  { %v738_v10 = vpop.f32.mrf.mxu2 }
 0x40e   :  { %v739_v13 = vadd.f32 %v738_v10, %v1629_v20 }
 0x410   :  { %v742_v15 = vmax.f32 %v739_v13, 0.0 }
 0x412   :  { %v744_v18 = vmul.f32 %v742_v15, %v1634_v29 }
 0x414   :  { %v745_v22 = vadd.f32 %v744_v18, %v743_v17 }
 0x415   :  { %v842_v23 = vpop.f32.mrf.mxu2 }
 0x416   :  { %v746_v25 = vrot.slane %v745_v22, 4  ;;  %v843_v43 = vadd.f32 %v842_v23, %v1554_v28 }
 0x418   :  { %v747_v27 = vadd.f32 %v746_v25, %v745_v22  ;;  %v854_v46 = vmax.f32 %v843_v43, 0.0  ;;  %v1372_v43 = vld [vmem:[%s1896_s3 + $0x8] sm:$0xff] }
 0x41a   :  { %v748_v30 = vrot.slane %v747_v27, 2 }
 0x41c   :  { %v749_v31 = vadd.f32 %v748_v30, %v747_v27 }
 0x41d   :  { %v845_v32 = vpop.f32.mrf.mxu2 }
 0x41e   :  { %v750_v33 = vrot.slane %v749_v31, 1  ;;  %v846_v40 = vadd.f32 %v845_v32, %v1548_v21 }
 0x420   :  { %v751_v34 = vadd.f32 %v750_v33, %v749_v31  ;;  %v855_v45 = vmax.f32 %v846_v40, 0.0  ;;  %v1104_v40 = vld [vmem:[#allocation3 + $0x70] sm:$0xff] }
 0x422   :  { %v752_v35 = vadd.f32 %v751_v34, %v1642_v51 }
 0x424   :  { %753 = vst [vmem:[#allocation6 + $0x8] sm:$0x1] %v752_v35 }
 0x425   :  { %v848_v36 = vpop.f32.mrf.mxu2 }
 0x426   :  { %v849_v38 = vadd.f32 %v848_v36, %v1550_v24 }
 0x428   :  { %v856_v44 = vmax.f32 %v849_v38, 0.0 }
 0x42d   :  { %v851_v37 = vpop.f32.mrf.mxu2 }
 0x42e   :  { %v852_v39 = vadd.f32 %v851_v37, %v1546_v19 }
 0x430   :  { %v857_v42 = vmax.f32 %v852_v39, 0.0 }
 0x432   :  { %870 = vmatpush.msra.mxu3 %v857_v42  ;;  %v1371_v42 = vld [vmem:[%s1896_s3] sm:$0xff]  ;;  %s1427_s3 = smov [#allocation6]  }
 0x433   :  { %s1248_s17 = sshll.u32 %s1427_s3, 4  ;;  %s1249_s17 = int_to_ptr.vmem [resolvable:$true] %s1248_s17 }
 0x434   :  { %871 = vmatpush.msra.mxu3 %v856_v44 }
 0x436   :  { %872 = vmatpush.msra.mxu3 %v855_v45 }
 0x438   :  { %873 = vmatpush.msra.mxu3 %v854_v46 }
 0x439   :  { %1327 = vmatmul.msk.f32.vlgmr.msra.gmra.mxu3 %vm135_vm1, %v1564_v41 }
 0x43a   :  { %980 = vmatpush.msrb.mxu3 %v964_v47 }
 0x43d   :  { %v1225_v48 = vpop.f32.mrf.mxu1 }
 0x43e   :  { %v1226_v50 = vadd.f32 %v1225_v48, %v1626_v16 }
 0x440   :  { %v1231_v53 = vmax.f32 %v1226_v50, 0.0 }
 0x441   :  { %1328 = vmatmul.msk.f32.gmra.mxu3 %vm135_vm1, %v1575_v49 }
 0x442   :  { %v1233_v41 = vmul.f32 %v1231_v53, %v1632_v26 }
 0x445   :  { %v1228_v52 = vpop.f32.mrf.mxu1 }
 0x446   :  { %v1229_v54 = vadd.f32 %v1228_v52, %v1629_v20 }
 0x448   :  { %v1232_v55 = vmax.f32 %v1229_v54, 0.0 }
 0x449   :  { %1335 = vmatmul.msk.f32.vlgmr.msrb.gmra.mxu3 %vm79_vm0, %v1367_v56 }
 0x44a   :  { %v1234_v57 = vmul.f32 %v1232_v55, %v1634_v29 }
 0x44c   :  { %v1235_v58 = vadd.f32 %v1234_v57, %v1233_v41 }
 0x44e   :  { %v1236_v4 = vrot.slane %v1235_v58, 4 }
 0x450   :  { %v1237_v49 = vadd.f32 %v1236_v4, %v1235_v58 }
 0x451   :  { %1336 = vmatmul.msk.f32.gmra.mxu3 %vm79_vm0, %v1368_v59 }
 0x452   :  { %v1238_v60 = vrot.slane %v1237_v49, 2 }
 0x454   :  { %v1239_v61 = vadd.f32 %v1238_v60, %v1237_v49 }
 0x456   :  { %v1240_v62 = vrot.slane %v1239_v61, 1 }
 0x458   :  { %v1241_v63 = vadd.f32 %v1240_v62, %v1239_v61 }
 0x459   :  { %1337 = vmatmul.msk.f32.gmra.mxu3 %vm79_vm0, %v1369_v8 }
 0x45a   :  { %v1242_v0 = vadd.f32 %v1241_v63, %v1642_v51 }
 0x45c   :  { %1243 = vst [vmem:[#allocation6 + $0xf] sm:$0x1] %v1242_v0 }
 0x461   :  { %1338 = vmatmul.msk.f32.gmra.mxu3 %vm79_vm0, %v1370_v1 }
 0x4bc   :  { %v875_v2 = vpop.f32.mrf.mxu3 }
 0x4bd   :  { %v876_v3 = vadd.f32 %v875_v2, %v1626_v16 }
 0x4bf   :  { %v881_v5 = vmax.f32 %v876_v3, 0.0 }
 0x4c1   :  { %v883_v14 = vmul.f32 %v881_v5, %v1632_v26 }
 0x4c4   :  { %v878_v11 = vpop.f32.mrf.mxu3 }
 0x4c5   :  { %v879_v6 = vadd.f32 %v878_v11, %v1629_v20 }
 0x4c7   :  { %v882_v7 = vmax.f32 %v879_v6, 0.0 }
 0x4c9   :  { %v884_v9 = vmul.f32 %v882_v7, %v1634_v29 }
 0x4cb   :  { %v885_v10 = vadd.f32 %v884_v9, %v883_v14 }
 0x4cc   :  { %v982_v12 = vpop.f32.mrf.mxu3 }
 0x4cd   :  { %v886_v13 = vrot.slane %v885_v10, 4  ;;  %v983_v36 = vadd.f32 %v982_v12, %v1554_v28 }
 0x4cf   :  { %v887_v15 = vadd.f32 %v886_v13, %v885_v10  ;;  %v994_v39 = vmax.f32 %v983_v36, 0.0 }
 0x4d1   :  { %v888_v17 = vrot.slane %v887_v15, 2 }
 0x4d3   :  { %v889_v18 = vadd.f32 %v888_v17, %v887_v15 }
 0x4d4   :  { %v985_v22 = vpop.f32.mrf.mxu3 }
 0x4d5   :  { %v890_v23 = vrot.slane %v889_v18, 1  ;;  %v986_v34 = vadd.f32 %v985_v22, %v1548_v21 }
 0x4d7   :  { %v891_v25 = vadd.f32 %v890_v23, %v889_v18  ;;  %v995_v38 = vmax.f32 %v986_v34, 0.0 }
 0x4d9   :  { %v892_v27 = vadd.f32 %v891_v25, %v1642_v51 }
 0x4db   :  { %893 = vst [vmem:[#allocation6 + $0xa] sm:$0x1] %v892_v27 }
 0x4dc   :  { %v988_v30 = vpop.f32.mrf.mxu3 }
 0x4dd   :  { %v989_v32 = vadd.f32 %v988_v30, %v1550_v24 }
 0x4df   :  { %v996_v37 = vmax.f32 %v989_v32, 0.0 }
 0x4e4   :  { %v991_v31 = vpop.f32.mrf.mxu3 }
 0x4e5   :  { %v992_v33 = vadd.f32 %v991_v31, %v1546_v19 }
 0x4e7   :  { %v997_v35 = vmax.f32 %v992_v33, 0.0 }
 0x4e9   :  { %1010 = vmatpush.msra.mxu2 %v997_v35 }
 0x4eb   :  { %1011 = vmatpush.msra.mxu2 %v996_v37 }
 0x4ed   :  { %1012 = vmatpush.msra.mxu2 %v995_v38 }
 0x4ef   :  { %1013 = vmatpush.msra.mxu2 %v994_v39 }
 0x4f0   :  { %1339 = vmatmul.msk.f32.vlgmr.msra.gmra.mxu2 %vm135_vm1, %v1371_v42 }
 0x4f1   :  { %1120 = vmatpush.msrb.mxu2 %v1104_v40 }
 0x4f8   :  { %1340 = vmatmul.msk.f32.gmra.mxu2 %vm135_vm1, %v1372_v43 }
 0x500   :  { %1347 = vmatmul.msk.f32.vlgmr.msrb.gmra.mxu2 %vm79_vm0, %v1367_v56 }
 0x508   :  { %1348 = vmatmul.msk.f32.gmra.mxu2 %vm79_vm0, %v1368_v59 }
 0x510   :  { %1349 = vmatmul.msk.f32.gmra.mxu2 %vm79_vm0, %v1369_v8 }
 0x518   :  { %1350 = vmatmul.msk.f32.gmra.mxu2 %vm79_vm0, %v1370_v1 }
 0x573   :  { %v1015_v44 = vpop.f32.mrf.mxu2 }
 0x574   :  { %v1016_v45 = vadd.f32 %v1015_v44, %v1626_v16 }
 0x576   :  { %v1021_v47 = vmax.f32 %v1016_v45, 0.0 }
 0x578   :  { %v1023_v52 = vmul.f32 %v1021_v47, %v1632_v26 }
 0x57b   :  { %v1018_v46 = vpop.f32.mrf.mxu2 }
 0x57c   :  { %v1019_v48 = vadd.f32 %v1018_v46, %v1629_v20 }
 0x57e   :  { %v1022_v50 = vmax.f32 %v1019_v48, 0.0 }
 0x580   :  { %v1024_v53 = vmul.f32 %v1022_v50, %v1634_v29 }
 0x582   :  { %v1025_v54 = vadd.f32 %v1024_v53, %v1023_v52 }
 0x583   :  { %v1122_v55 = vpop.f32.mrf.mxu2 }
 0x584   :  { %v1026_v56 = vrot.slane %v1025_v54, 4  ;;  %v1123_v2 = vadd.f32 %v1122_v55, %v1554_v28 }
 0x586   :  { %v1027_v41 = vadd.f32 %v1026_v56, %v1025_v54  ;;  %v1134_v5 = vmax.f32 %v1123_v2, 0.0 }
 0x588   :  { %v1028_v57 = vrot.slane %v1027_v41, 2 }
 0x58a   :  { %v1029_v58 = vadd.f32 %v1028_v57, %v1027_v41 }
 0x58b   :  { %v1125_v4 = vpop.f32.mrf.mxu2 }
 0x58c   :  { %v1030_v49 = vrot.slane %v1029_v58, 1  ;;  %v1126_v0 = vadd.f32 %v1125_v4, %v1548_v21 }
 0x58e   :  { %v1031_v59 = vadd.f32 %v1030_v49, %v1029_v58  ;;  %v1135_v11 = vmax.f32 %v1126_v0, 0.0 }
 0x590   :  { %v1032_v60 = vadd.f32 %v1031_v59, %v1642_v51 }
 0x592   :  { %1033 = vst [vmem:[#allocation6 + $0xc] sm:$0x1] %v1032_v60 }
 0x593   :  { %v1128_v61 = vpop.f32.mrf.mxu2 }
 0x594   :  { %v1129_v63 = vadd.f32 %v1128_v61, %v1550_v24 }
 0x596   :  { %v1136_v3 = vmax.f32 %v1129_v63, 0.0 }
 0x59b   :  { %v1131_v62 = vpop.f32.mrf.mxu2 }
 0x59c   :  { %v1132_v8 = vadd.f32 %v1131_v62, %v1546_v19 }
 0x59e   :  { %v1137_v1 = vmax.f32 %v1132_v8, 0.0 }
 0x5a0   :  { %1150 = vmatpush.msra.mxu3 %v1137_v1 }
 0x5a2   :  { %1151 = vmatpush.msra.mxu3 %v1136_v3 }
 0x5a4   :  { %1152 = vmatpush.msra.mxu3 %v1135_v11 }
 0x5a6   :  { %1153 = vmatpush.msra.mxu3 %v1134_v5 }
 0x5a7   :  { %1351 = vmatmul.msk.f32.vlgmr.msra.gmra.mxu3 %vm135_vm1, %v1371_v42 }
 0x5af   :  { %1352 = vmatmul.msk.f32.gmra.mxu3 %vm135_vm1, %v1372_v43 }
 0x62a   :  { %v1155_v6 = vpop.f32.mrf.mxu3 }
 0x62b   :  { %v1156_v24 = vadd.f32 %v1155_v6, %v1626_v16 }
 0x62d   :  { %v1161_v7 = vmax.f32 %v1156_v24, 0.0 }
 0x62f   :  { %v1163_v28 = vmul.f32 %v1161_v7, %v1632_v26 }
 0x632   :  { %v1158_v19 = vpop.f32.mrf.mxu3 }
 0x633   :  { %v1159_v21 = vadd.f32 %v1158_v19, %v1629_v20 }
 0x635   :  { %v1162_v14 = vmax.f32 %v1159_v21, 0.0 }
 0x637   :  { %v1164_v9 = vmul.f32 %v1162_v14, %v1634_v29 }
 0x639   :  { %v1165_v10 = vadd.f32 %v1164_v9, %v1163_v28 }
 0x63b   :  { %v1166_v12 = vrot.slane %v1165_v10, 4 }
 0x63d   :  { %v1167_v13 = vadd.f32 %v1166_v12, %v1165_v10 }
 0x63f   :  { %v1168_v15 = vrot.slane %v1167_v13, 2 }
 0x641   :  { %v1169_v17 = vadd.f32 %v1168_v15, %v1167_v13 }
 0x643   :  { %v1170_v18 = vrot.slane %v1169_v17, 1 }
 0x645   :  { %v1171_v16 = vadd.f32 %v1170_v18, %v1169_v17 }
 0x647   :  { %v1172_v20 = vadd.f32 %v1171_v16, %v1642_v51 }
 0x649   :  { %1173 = vst [vmem:[#allocation6 + $0xe] sm:$0x1] %v1172_v20 }
 0x64a   :  { %1256 = dma.vmem_to_hbm [thread:$0]  %s1249_s17, 256, %s1251_s20, [#allocation5], %s1428_s21, %s1428_s21, %s1429_s22  }
 0x64b   :  { %1423 = dma.done.wait [#allocation5], 256  }
 0x64c   :  { %1424 = vsyncadd [#allocation5], 4294967040 }
 0x64d   :  { %1261 = vsyncpa [#allocation4], 1 }
 0x64e   :  { %1262 = vsyncpa [#allocation5], 1 }

</bundles_post_ra>
